<compile_context>
chip_gen: v7x
topology: tpu7x:2x2x1
jax: 0.10.0
libtpu: 0.0.40
codegen_flags: <defaults>
</compile_context>

<pallas_src>
import jax
import jax.numpy as jnp
from jax.experimental import pallas as pl
from jax.experimental.pallas import tpu as pltpu

VOCAB = 148
VOCAB_PAD = 256          # lane-friendly padded vocab (padded rows of M are zero)
SEQ_LEN = 10


def fcnet_emb_kernel(x_ref, m_ref, b1_ref, w2_ref, b2_ref,
                     w3_ref, b3_ref, w4_ref, b4_ref, out_ref, oh_ref):
    idx = x_ref[...]                                           # (TB, L) int32
    TB = idx.shape[0]

    vocab_ids = jax.lax.broadcasted_iota(jnp.int32, (TB, VOCAB_PAD), 1)

    # Fused embedding + fc1: write each position's one-hot into a 256-lane-
    # aligned slab of the VMEM scratch, then do a single (TB,2560)@(2560,256)
    # MXU contraction.  Token ids >= 148 hit the zero-padded rows of M.
    for l in range(SEQ_LEN):
        oh_ref[:, l * VOCAB_PAD:(l + 1) * VOCAB_PAD] = (
            idx[:, l:l + 1] == vocab_ids).astype(jnp.bfloat16)

    h = jnp.dot(oh_ref[...], m_ref[...], preferred_element_type=jnp.float32)
    h = jnp.maximum(h + b1_ref[...], 0.0)

    # fc2 -> relu
    h = jnp.maximum(jnp.dot(h.astype(jnp.bfloat16), w2_ref[...],
                            preferred_element_type=jnp.float32) + b2_ref[...], 0.0)
    # fc3 -> relu
    h = jnp.maximum(jnp.dot(h.astype(jnp.bfloat16), w3_ref[...],
                            preferred_element_type=jnp.float32) + b3_ref[...], 0.0)
    # fc4 (classes padded to 128 lanes; padded bias = -1e30 so exp -> 0)
    logits = jnp.dot(h.astype(jnp.bfloat16), w4_ref[...],
                     preferred_element_type=jnp.float32) + b4_ref[...]

    # softmax over classes (nn.Softmax() on 2-D input -> dim=1); exact divide.
    z = logits - jnp.max(logits, axis=-1, keepdims=True)
    e = jnp.exp(z)
    out_ref[...] = e / jnp.sum(e, axis=-1, keepdims=True)


def _round_up(n, m):
    return (n + m - 1) // m * m


def fcnet_emb_forward(x, params, block_b=512):
    """x: (B, 10) int32 token ids. Returns (B, num_classes) f32 probabilities."""
    emb, w1, b1, w2, b2, w3, b3, w4, b4 = params
    B = x.shape[0]
    E = emb.shape[1]
    H1 = w1.shape[1]
    num_classes = w4.shape[1]
    nc_pad = _round_up(num_classes, 128)     # lane-dense output width

    # ---- one-time parameter prep (would be cached alongside the params) ----
    emb_pad = jnp.zeros((VOCAB_PAD, E), jnp.float32).at[:VOCAB].set(emb)
    m = jnp.einsum('ve,leh->lvh', emb_pad,
                   w1.reshape(SEQ_LEN, E, H1))                     # (L, Vp, H1)
    m = m.reshape(SEQ_LEN * VOCAB_PAD, H1).astype(jnp.bfloat16)    # (2560, 256)
    w2b = w2.astype(jnp.bfloat16)
    w3b = w3.astype(jnp.bfloat16)
    w4b = jnp.zeros((w4.shape[0], nc_pad), jnp.bfloat16)
    w4b = w4b.at[:, :num_classes].set(w4.astype(jnp.bfloat16))
    b1r = b1.reshape(1, -1).astype(jnp.float32)
    b2r = b2.reshape(1, -1).astype(jnp.float32)
    b3r = b3.reshape(1, -1).astype(jnp.float32)
    b4r = jnp.full((1, nc_pad), -1e30, jnp.float32)
    b4r = b4r.at[0, :num_classes].set(b4.astype(jnp.float32))

    # ---- batch tiling: at least 2 grid steps for mid-size B (v7x megacore) ----
    half = _round_up(max(1, -(-B // 2)), 8)
    tb = max(8, min(block_b, half))
    bp = _round_up(B, tb)
    x_pad = x if bp == B else jnp.pad(x, ((0, bp - B), (0, 0)))
    grid = (bp // tb,)

    resident = lambda i: (0, 0)
    in_specs = [
        pl.BlockSpec((tb, SEQ_LEN), lambda i: (i, 0)),    # x (batch-tiled)
        pl.BlockSpec(m.shape, resident),                  # fused emb@W1 (2560, 256)
        pl.BlockSpec(b1r.shape, resident),                # b1
        pl.BlockSpec(w2b.shape, resident),                # w2
        pl.BlockSpec(b2r.shape, resident),                # b2
        pl.BlockSpec(w3b.shape, resident),                # w3
        pl.BlockSpec(b3r.shape, resident),                # b3
        pl.BlockSpec(w4b.shape, resident),                # w4 (padded to 128)
        pl.BlockSpec(b4r.shape, resident),                # b4 (padded, -1e30)
    ]
    out_spec = pl.BlockSpec((tb, nc_pad), lambda i: (i, 0))

    out = pl.pallas_call(
        fcnet_emb_kernel,
        out_shape=jax.ShapeDtypeStruct((bp, nc_pad), jnp.float32),
        grid=grid,
        in_specs=in_specs,
        out_specs=out_spec,
        scratch_shapes=[pltpu.VMEM((tb, SEQ_LEN * VOCAB_PAD), jnp.bfloat16)],
        compiler_params=pltpu.CompilerParams(
            dimension_semantics=("parallel",)),
    )(x_pad, m, b1r, w2b, b2r, w3b, b3r, w4b, b4r)
    return out[:B, :num_classes]


def init_params(key, embed_size, num_classes):
    """Deterministic synthetic init (PyTorch-style scales), weights as (in, out)."""
    ks = jax.random.split(key, 9)

    def linear(kw, kb, fan_in, fan_out):
        bound = 1.0 / jnp.sqrt(fan_in)
        w = jax.random.uniform(kw, (fan_in, fan_out), jnp.float32, -bound, bound)
        b = jax.random.uniform(kb, (fan_out,), jnp.float32, -bound, bound)
        return w, b

    emb = jax.random.normal(ks[0], (VOCAB, embed_size), jnp.float32)
    w1, b1 = linear(ks[1], ks[2], SEQ_LEN * embed_size, 256)
    w2, b2 = linear(ks[3], ks[4], 256, 128)
    w3, b3 = linear(ks[5], ks[6], 128, 32)
    w4, b4 = linear(ks[7], ks[8], 32, num_classes)
    return (emb, w1, b1, w2, b2, w3, b3, w4, b4)


def reference_forward(x, params):
    emb, w1, b1, w2, b2, w3, b3, w4, b4 = params
    h = emb[x].reshape(x.shape[0], -1)
    h = jax.nn.relu(h @ w1 + b1)
    h = jax.nn.relu(h @ w2 + b2)
    h = jax.nn.relu(h @ w3 + b3)
    return jax.nn.softmax(h @ w4 + b4, axis=-1)


if __name__ == "__main__":
    embed_size = 16
    num_classes = 4
    batch = 8

    key = jax.random.PRNGKey(0)
    k_params, k_x = jax.random.split(key)
    params = init_params(k_params, embed_size, num_classes)
    x = jax.random.randint(k_x, (batch, SEQ_LEN), 0, VOCAB, dtype=jnp.int32)

    out = jax.block_until_ready(fcnet_emb_forward(x, params))
    ref = reference_forward(x, params)

    assert out.shape == (batch, num_classes)
    assert bool(jnp.all(jnp.isfinite(out)))
    # exact softmax divide -> rows sum to 1 to f32 precision
    assert jnp.allclose(jnp.sum(out, axis=-1), 1.0, atol=1e-5)
    # bf16 weights -> compare to the f32 reference loosely
    assert jnp.allclose(out, ref, atol=2e-2, rtol=2e-2)

    print("KERNEL_OK")
</pallas_src>

<mosaic_0001>
module attributes {stable_mosaic.version = 11 : i64} {
  func.func @fcnet_emb_kernel(%arg0: i32, %arg1: memref<8x10xi32, #tpu.memory_space<vmem>>, %arg2: memref<2560x256xbf16, #tpu.memory_space<vmem>>, %arg3: memref<1x256xf32, #tpu.memory_space<vmem>>, %arg4: memref<256x128xbf16, #tpu.memory_space<vmem>>, %arg5: memref<1x128xf32, #tpu.memory_space<vmem>>, %arg6: memref<128x32xbf16, #tpu.memory_space<vmem>>, %arg7: memref<1x32xf32, #tpu.memory_space<vmem>>, %arg8: memref<32x128xbf16, #tpu.memory_space<vmem>>, %arg9: memref<1x128xf32, #tpu.memory_space<vmem>>, %arg10: memref<8x128xf32, #tpu.memory_space<vmem>>, %arg11: memref<8x2560xbf16, #tpu.memory_space<vmem>>) attributes {dimension_semantics = [#tpu.dimension_semantics<parallel>], iteration_bounds = array<i64: 1>, scalar_prefetch = 0 : i64, scratch_operands = 1 : i64, tpu.core_type = #tpu.core_type<tc>, window_params = [{transform_indices = @transform_0, window_bounds = array<i64: 8, 10>}, {pipeline_mode = #tpu.pipeline_mode<synchronous>, transform_indices = @transform_1, window_bounds = array<i64: 2560, 256>}, {pipeline_mode = #tpu.pipeline_mode<synchronous>, transform_indices = @transform_2, window_bounds = array<i64: 1, 256>}, {pipeline_mode = #tpu.pipeline_mode<synchronous>, transform_indices = @transform_3, window_bounds = array<i64: 256, 128>}, {pipeline_mode = #tpu.pipeline_mode<synchronous>, transform_indices = @transform_4, window_bounds = array<i64: 1, 128>}, {pipeline_mode = #tpu.pipeline_mode<synchronous>, transform_indices = @transform_5, window_bounds = array<i64: 128, 32>}, {pipeline_mode = #tpu.pipeline_mode<synchronous>, transform_indices = @transform_6, window_bounds = array<i64: 1, 32>}, {pipeline_mode = #tpu.pipeline_mode<synchronous>, transform_indices = @transform_7, window_bounds = array<i64: 32, 128>}, {pipeline_mode = #tpu.pipeline_mode<synchronous>, transform_indices = @transform_8, window_bounds = array<i64: 1, 128>}, {transform_indices = @transform_9, window_bounds = array<i64: 8, 128>}]} {
    %c0 = arith.constant 0 : index
    %c0_0 = arith.constant 0 : index
    %0 = vector.load %arg1[%c0, %c0_0] : memref<8x10xi32, #tpu.memory_space<vmem>>, vector<8x10xi32>
    %1 = tpu.iota {dimensions = array<i32: 1>} : vector<8x256xi32>
    %2 = vector.extract_strided_slice %0 {offsets = [0, 0], sizes = [8, 1], strides = [1, 1]} : vector<8x10xi32> to vector<8x1xi32>
    %3 = vector.broadcast %2 : vector<8x1xi32> to vector<8x256xi32>
    %4 = arith.cmpi eq, %3, %1 : vector<8x256xi32>
    %5 = arith.extui %4 : vector<8x256xi1> to vector<8x256xi32>
    %6 = arith.sitofp %5 : vector<8x256xi32> to vector<8x256xf32>
    %7 = arith.truncf %6 : vector<8x256xf32> to vector<8x256xbf16>
    %c0_1 = arith.constant 0 : index
    %c0_2 = arith.constant 0 : index
    %8 = vector.load %arg11[%c0_1, %c0_2] : memref<8x2560xbf16, #tpu.memory_space<vmem>>, vector<8x256xbf16>
    tpu.vector_store %arg11[%c0_1, %c0_2], %7 {strides = array<i32>} : memref<8x2560xbf16, #tpu.memory_space<vmem>>, vector<8x256xbf16>,
    %9 = vector.extract_strided_slice %0 {offsets = [0, 1], sizes = [8, 1], strides = [1, 1]} : vector<8x10xi32> to vector<8x1xi32>
    %10 = vector.broadcast %9 : vector<8x1xi32> to vector<8x256xi32>
    %11 = arith.cmpi eq, %10, %1 : vector<8x256xi32>
    %12 = arith.extui %11 : vector<8x256xi1> to vector<8x256xi32>
    %13 = arith.sitofp %12 : vector<8x256xi32> to vector<8x256xf32>
    %14 = arith.truncf %13 : vector<8x256xf32> to vector<8x256xbf16>
    %c0_3 = arith.constant 0 : index
    %c256 = arith.constant 256 : index
    %15 = vector.load %arg11[%c0_3, %c256] : memref<8x2560xbf16, #tpu.memory_space<vmem>>, vector<8x256xbf16>
    tpu.vector_store %arg11[%c0_3, %c256], %14 {strides = array<i32>} : memref<8x2560xbf16, #tpu.memory_space<vmem>>, vector<8x256xbf16>,
    %16 = vector.extract_strided_slice %0 {offsets = [0, 2], sizes = [8, 1], strides = [1, 1]} : vector<8x10xi32> to vector<8x1xi32>
    %17 = vector.broadcast %16 : vector<8x1xi32> to vector<8x256xi32>
    %18 = arith.cmpi eq, %17, %1 : vector<8x256xi32>
    %19 = arith.extui %18 : vector<8x256xi1> to vector<8x256xi32>
    %20 = arith.sitofp %19 : vector<8x256xi32> to vector<8x256xf32>
    %21 = arith.truncf %20 : vector<8x256xf32> to vector<8x256xbf16>
    %c0_4 = arith.constant 0 : index
    %c512 = arith.constant 512 : index
    %22 = vector.load %arg11[%c0_4, %c512] : memref<8x2560xbf16, #tpu.memory_space<vmem>>, vector<8x256xbf16>
    tpu.vector_store %arg11[%c0_4, %c512], %21 {strides = array<i32>} : memref<8x2560xbf16, #tpu.memory_space<vmem>>, vector<8x256xbf16>,
    %23 = vector.extract_strided_slice %0 {offsets = [0, 3], sizes = [8, 1], strides = [1, 1]} : vector<8x10xi32> to vector<8x1xi32>
    %24 = vector.broadcast %23 : vector<8x1xi32> to vector<8x256xi32>
    %25 = arith.cmpi eq, %24, %1 : vector<8x256xi32>
    %26 = arith.extui %25 : vector<8x256xi1> to vector<8x256xi32>
    %27 = arith.sitofp %26 : vector<8x256xi32> to vector<8x256xf32>
    %28 = arith.truncf %27 : vector<8x256xf32> to vector<8x256xbf16>
    %c0_5 = arith.constant 0 : index
    %c768 = arith.constant 768 : index
    %29 = vector.load %arg11[%c0_5, %c768] : memref<8x2560xbf16, #tpu.memory_space<vmem>>, vector<8x256xbf16>
    tpu.vector_store %arg11[%c0_5, %c768], %28 {strides = array<i32>} : memref<8x2560xbf16, #tpu.memory_space<vmem>>, vector<8x256xbf16>,
    %30 = vector.extract_strided_slice %0 {offsets = [0, 4], sizes = [8, 1], strides = [1, 1]} : vector<8x10xi32> to vector<8x1xi32>
    %31 = vector.broadcast %30 : vector<8x1xi32> to vector<8x256xi32>
    %32 = arith.cmpi eq, %31, %1 : vector<8x256xi32>
    %33 = arith.extui %32 : vector<8x256xi1> to vector<8x256xi32>
    %34 = arith.sitofp %33 : vector<8x256xi32> to vector<8x256xf32>
    %35 = arith.truncf %34 : vector<8x256xf32> to vector<8x256xbf16>
    %c0_6 = arith.constant 0 : index
    %c1024 = arith.constant 1024 : index
    %36 = vector.load %arg11[%c0_6, %c1024] : memref<8x2560xbf16, #tpu.memory_space<vmem>>, vector<8x256xbf16>
    tpu.vector_store %arg11[%c0_6, %c1024], %35 {strides = array<i32>} : memref<8x2560xbf16, #tpu.memory_space<vmem>>, vector<8x256xbf16>,
    %37 = vector.extract_strided_slice %0 {offsets = [0, 5], sizes = [8, 1], strides = [1, 1]} : vector<8x10xi32> to vector<8x1xi32>
    %38 = vector.broadcast %37 : vector<8x1xi32> to vector<8x256xi32>
    %39 = arith.cmpi eq, %38, %1 : vector<8x256xi32>
    %40 = arith.extui %39 : vector<8x256xi1> to vector<8x256xi32>
    %41 = arith.sitofp %40 : vector<8x256xi32> to vector<8x256xf32>
    %42 = arith.truncf %41 : vector<8x256xf32> to vector<8x256xbf16>
    %c0_7 = arith.constant 0 : index
    %c1280 = arith.constant 1280 : index
    %43 = vector.load %arg11[%c0_7, %c1280] : memref<8x2560xbf16, #tpu.memory_space<vmem>>, vector<8x256xbf16>
    tpu.vector_store %arg11[%c0_7, %c1280], %42 {strides = array<i32>} : memref<8x2560xbf16, #tpu.memory_space<vmem>>, vector<8x256xbf16>,
    %44 = vector.extract_strided_slice %0 {offsets = [0, 6], sizes = [8, 1], strides = [1, 1]} : vector<8x10xi32> to vector<8x1xi32>
    %45 = vector.broadcast %44 : vector<8x1xi32> to vector<8x256xi32>
    %46 = arith.cmpi eq, %45, %1 : vector<8x256xi32>
    %47 = arith.extui %46 : vector<8x256xi1> to vector<8x256xi32>
    %48 = arith.sitofp %47 : vector<8x256xi32> to vector<8x256xf32>
    %49 = arith.truncf %48 : vector<8x256xf32> to vector<8x256xbf16>
    %c0_8 = arith.constant 0 : index
    %c1536 = arith.constant 1536 : index
    %50 = vector.load %arg11[%c0_8, %c1536] : memref<8x2560xbf16, #tpu.memory_space<vmem>>, vector<8x256xbf16>
    tpu.vector_store %arg11[%c0_8, %c1536], %49 {strides = array<i32>} : memref<8x2560xbf16, #tpu.memory_space<vmem>>, vector<8x256xbf16>,
    %51 = vector.extract_strided_slice %0 {offsets = [0, 7], sizes = [8, 1], strides = [1, 1]} : vector<8x10xi32> to vector<8x1xi32>
    %52 = vector.broadcast %51 : vector<8x1xi32> to vector<8x256xi32>
    %53 = arith.cmpi eq, %52, %1 : vector<8x256xi32>
    %54 = arith.extui %53 : vector<8x256xi1> to vector<8x256xi32>
    %55 = arith.sitofp %54 : vector<8x256xi32> to vector<8x256xf32>
    %56 = arith.truncf %55 : vector<8x256xf32> to vector<8x256xbf16>
    %c0_9 = arith.constant 0 : index
    %c1792 = arith.constant 1792 : index
    %57 = vector.load %arg11[%c0_9, %c1792] : memref<8x2560xbf16, #tpu.memory_space<vmem>>, vector<8x256xbf16>
    tpu.vector_store %arg11[%c0_9, %c1792], %56 {strides = array<i32>} : memref<8x2560xbf16, #tpu.memory_space<vmem>>, vector<8x256xbf16>,
    %58 = vector.extract_strided_slice %0 {offsets = [0, 8], sizes = [8, 1], strides = [1, 1]} : vector<8x10xi32> to vector<8x1xi32>
    %59 = vector.broadcast %58 : vector<8x1xi32> to vector<8x256xi32>
    %60 = arith.cmpi eq, %59, %1 : vector<8x256xi32>
    %61 = arith.extui %60 : vector<8x256xi1> to vector<8x256xi32>
    %62 = arith.sitofp %61 : vector<8x256xi32> to vector<8x256xf32>
    %63 = arith.truncf %62 : vector<8x256xf32> to vector<8x256xbf16>
    %c0_10 = arith.constant 0 : index
    %c2048 = arith.constant 2048 : index
    %64 = vector.load %arg11[%c0_10, %c2048] : memref<8x2560xbf16, #tpu.memory_space<vmem>>, vector<8x256xbf16>
    tpu.vector_store %arg11[%c0_10, %c2048], %63 {strides = array<i32>} : memref<8x2560xbf16, #tpu.memory_space<vmem>>, vector<8x256xbf16>,
    %65 = vector.extract_strided_slice %0 {offsets = [0, 9], sizes = [8, 1], strides = [1, 1]} : vector<8x10xi32> to vector<8x1xi32>
    %66 = vector.broadcast %65 : vector<8x1xi32> to vector<8x256xi32>
    %67 = arith.cmpi eq, %66, %1 : vector<8x256xi32>
    %68 = arith.extui %67 : vector<8x256xi1> to vector<8x256xi32>
    %69 = arith.sitofp %68 : vector<8x256xi32> to vector<8x256xf32>
    %70 = arith.truncf %69 : vector<8x256xf32> to vector<8x256xbf16>
    %c0_11 = arith.constant 0 : index
    %c2304 = arith.constant 2304 : index
    %71 = vector.load %arg11[%c0_11, %c2304] : memref<8x2560xbf16, #tpu.memory_space<vmem>>, vector<8x256xbf16>
    tpu.vector_store %arg11[%c0_11, %c2304], %70 {strides = array<i32>} : memref<8x2560xbf16, #tpu.memory_space<vmem>>, vector<8x256xbf16>,
    %c0_12 = arith.constant 0 : index
    %c0_13 = arith.constant 0 : index
    %72 = vector.load %arg11[%c0_12, %c0_13] : memref<8x2560xbf16, #tpu.memory_space<vmem>>, vector<8x2560xbf16>
    %c0_14 = arith.constant 0 : index
    %c0_15 = arith.constant 0 : index
    %73 = vector.load %arg2[%c0_14, %c0_15] : memref<2560x256xbf16, #tpu.memory_space<vmem>>, vector<2560x256xbf16>
    %cst = arith.constant dense<0.000000e+00> : vector<8x256xf32>
    %74 = tpu.matmul %72, %73, %cst {dimension_numbers = #tpu.dot_dimension_numbers<[1], [0], [0], [1], [0, 0, 1, 1], [], []>} : vector<8x2560xbf16>, vector<2560x256xbf16>, vector<8x256xf32> -> vector<8x256xf32>
    %c0_16 = arith.constant 0 : index
    %c0_17 = arith.constant 0 : index
    %75 = vector.load %arg3[%c0_16, %c0_17] : memref<1x256xf32, #tpu.memory_space<vmem>>, vector<1x256xf32>
    %76 = vector.broadcast %75 : vector<1x256xf32> to vector<8x256xf32>
    %77 = arith.addf %74, %76 : vector<8x256xf32>
    %cst_18 = arith.constant 0.000000e+00 : f32
    %78 = vector.broadcast %cst_18 : f32 to vector<8x256xf32>
    %79 = arith.maximumf %77, %78 : vector<8x256xf32>
    %80 = arith.truncf %79 : vector<8x256xf32> to vector<8x256xbf16>
    %c0_19 = arith.constant 0 : index
    %c0_20 = arith.constant 0 : index
    %81 = vector.load %arg4[%c0_19, %c0_20] : memref<256x128xbf16, #tpu.memory_space<vmem>>, vector<256x128xbf16>
    %cst_21 = arith.constant dense<0.000000e+00> : vector<8x128xf32>
    %82 = tpu.matmul %80, %81, %cst_21 {dimension_numbers = #tpu.dot_dimension_numbers<[1], [0], [0], [1], [0, 0, 1, 1], [], []>} : vector<8x256xbf16>, vector<256x128xbf16>, vector<8x128xf32> -> vector<8x128xf32>
    %c0_22 = arith.constant 0 : index
    %c0_23 = arith.constant 0 : index
    %83 = vector.load %arg5[%c0_22, %c0_23] : memref<1x128xf32, #tpu.memory_space<vmem>>, vector<1x128xf32>
    %84 = vector.broadcast %83 : vector<1x128xf32> to vector<8x128xf32>
    %85 = arith.addf %82, %84 : vector<8x128xf32>
    %cst_24 = arith.constant 0.000000e+00 : f32
    %86 = vector.broadcast %cst_24 : f32 to vector<8x128xf32>
    %87 = arith.maximumf %85, %86 : vector<8x128xf32>
    %88 = arith.truncf %87 : vector<8x128xf32> to vector<8x128xbf16>
    %c0_25 = arith.constant 0 : index
    %c0_26 = arith.constant 0 : index
    %89 = vector.load %arg6[%c0_25, %c0_26] : memref<128x32xbf16, #tpu.memory_space<vmem>>, vector<128x32xbf16>
    %cst_27 = arith.constant dense<0.000000e+00> : vector<8x32xf32>
    %90 = tpu.matmul %88, %89, %cst_27 {dimension_numbers = #tpu.dot_dimension_numbers<[1], [0], [0], [1], [0, 0, 1, 1], [], []>} : vector<8x128xbf16>, vector<128x32xbf16>, vector<8x32xf32> -> vector<8x32xf32>
    %c0_28 = arith.constant 0 : index
    %c0_29 = arith.constant 0 : index
    %91 = vector.load %arg7[%c0_28, %c0_29] : memref<1x32xf32, #tpu.memory_space<vmem>>, vector<1x32xf32>
    %92 = vector.broadcast %91 : vector<1x32xf32> to vector<8x32xf32>
    %93 = arith.addf %90, %92 : vector<8x32xf32>
    %cst_30 = arith.constant 0.000000e+00 : f32
    %94 = vector.broadcast %cst_30 : f32 to vector<8x32xf32>
    %95 = arith.maximumf %93, %94 : vector<8x32xf32>
    %96 = arith.truncf %95 : vector<8x32xf32> to vector<8x32xbf16>
    %c0_31 = arith.constant 0 : index
    %c0_32 = arith.constant 0 : index
    %97 = vector.load %arg8[%c0_31, %c0_32] : memref<32x128xbf16, #tpu.memory_space<vmem>>, vector<32x128xbf16>
    %cst_33 = arith.constant dense<0.000000e+00> : vector<8x128xf32>
    %98 = tpu.matmul %96, %97, %cst_33 {dimension_numbers = #tpu.dot_dimension_numbers<[1], [0], [0], [1], [0, 0, 1, 1], [], []>} : vector<8x32xbf16>, vector<32x128xbf16>, vector<8x128xf32> -> vector<8x128xf32>
    %c0_34 = arith.constant 0 : index
    %c0_35 = arith.constant 0 : index
    %99 = vector.load %arg9[%c0_34, %c0_35] : memref<1x128xf32, #tpu.memory_space<vmem>>, vector<1x128xf32>
    %100 = vector.broadcast %99 : vector<1x128xf32> to vector<8x128xf32>
    %101 = arith.addf %98, %100 : vector<8x128xf32>
    %cst_36 = arith.constant dense<0xFF800000> : vector<8xf32>
    %102 = vector.multi_reduction <maximumf>, %101, %cst_36 [1] : vector<8x128xf32> to vector<8xf32>
    %103 = vector.shape_cast %102 : vector<8xf32> to vector<8x1xf32>
    %104 = vector.broadcast %103 : vector<8x1xf32> to vector<8x128xf32>
    %105 = arith.subf %101, %104 : vector<8x128xf32>
    %106 = math.exp %105 : vector<8x128xf32>
    %cst_37 = arith.constant dense<0.000000e+00> : vector<8xf32>
    %107 = vector.multi_reduction <add>, %106, %cst_37 [1] : vector<8x128xf32> to vector<8xf32>
    %108 = vector.shape_cast %107 : vector<8xf32> to vector<8x1xf32>
    %109 = vector.broadcast %108 : vector<8x1xf32> to vector<8x128xf32>
    %110 = arith.divf %106, %109 : vector<8x128xf32>
    %c0_38 = arith.constant 0 : index
    %c0_39 = arith.constant 0 : index
    %111 = vector.load %arg10[%c0_38, %c0_39] : memref<8x128xf32, #tpu.memory_space<vmem>>, vector<8x128xf32>
    tpu.vector_store %arg10[%c0_38, %c0_39], %110 {strides = array<i32>} : memref<8x128xf32, #tpu.memory_space<vmem>>, vector<8x128xf32>,
    return
  }
  func.func @transform_0(%arg0: i32) -> (i32, i32) {
    %c0_i32 = arith.constant 0 : i32
    %c0_i32_0 = arith.constant 0 : i32
    return %arg0, %c0_i32 : i32, i32
  }
  func.func @transform_1(%arg0: i32) -> (i32, i32) {
    %c0_i32 = arith.constant 0 : i32
    %c0_i32_0 = arith.constant 0 : i32
    %c0_i32_1 = arith.constant 0 : i32
    return %c0_i32, %c0_i32_0 : i32, i32
  }
  func.func @transform_2(%arg0: i32) -> (i32, i32) {
    %c0_i32 = arith.constant 0 : i32
    %c0_i32_0 = arith.constant 0 : i32
    %c0_i32_1 = arith.constant 0 : i32
    return %c0_i32, %c0_i32_0 : i32, i32
  }
  func.func @transform_3(%arg0: i32) -> (i32, i32) {
    %c0_i32 = arith.constant 0 : i32
    %c0_i32_0 = arith.constant 0 : i32
    %c0_i32_1 = arith.constant 0 : i32
    return %c0_i32, %c0_i32_0 : i32, i32
  }
  func.func @transform_4(%arg0: i32) -> (i32, i32) {
    %c0_i32 = arith.constant 0 : i32
    %c0_i32_0 = arith.constant 0 : i32
    %c0_i32_1 = arith.constant 0 : i32
    return %c0_i32, %c0_i32_0 : i32, i32
  }
  func.func @transform_5(%arg0: i32) -> (i32, i32) {
    %c0_i32 = arith.constant 0 : i32
    %c0_i32_0 = arith.constant 0 : i32
    %c0_i32_1 = arith.constant 0 : i32
    return %c0_i32, %c0_i32_0 : i32, i32
  }
  func.func @transform_6(%arg0: i32) -> (i32, i32) {
    %c0_i32 = arith.constant 0 : i32
    %c0_i32_0 = arith.constant 0 : i32
    %c0_i32_1 = arith.constant 0 : i32
    return %c0_i32, %c0_i32_0 : i32, i32
  }
  func.func @transform_7(%arg0: i32) -> (i32, i32) {
    %c0_i32 = arith.constant 0 : i32
    %c0_i32_0 = arith.constant 0 : i32
    %c0_i32_1 = arith.constant 0 : i32
    return %c0_i32, %c0_i32_0 : i32, i32
  }
  func.func @transform_8(%arg0: i32) -> (i32, i32) {
    %c0_i32 = arith.constant 0 : i32
    %c0_i32_0 = arith.constant 0 : i32
    %c0_i32_1 = arith.constant 0 : i32
    return %c0_i32, %c0_i32_0 : i32, i32
  }
  func.func @transform_9(%arg0: i32) -> (i32, i32) {
    %c0_i32 = arith.constant 0 : i32
    %c0_i32_0 = arith.constant 0 : i32
    return %arg0, %c0_i32 : i32, i32
  }
}

</mosaic_0001>

<bundles_post_ra>
// kernel: tpu_custom_call.1
= control target key start
LH: loop header
LB: loop body
LE: loop exit
PB: predicated region body
PF: predicated region fallthrough
CT: control target
= control target key end

     0   :  { %14 = vsyncpa [#allocation4], 0  ;;  %s4765_s0 = inlined_call_operand.hbm [shape: s32[8,10], index: 0, kind: input, shape index: {}]   ;;  %s4766_s1 = inlined_call_operand.hbm [shape: bf16[2560,256], index: 1, kind: input, shape index: {}]   ;;  %s4767_s2 = inlined_call_operand.hbm [shape: f32[1,256], index: 2, kind: input, shape index: {}]   ;;  %s4768_s3 = inlined_call_operand.hbm [shape: bf16[256,128], index: 3, kind: input, shape index: {}]   ;;  %s4769_s4 = inlined_call_operand.hbm [shape: f32[1,128], index: 4, kind: input, shape index: {}]   ;;  %s4770_s5 = inlined_call_operand.vmem [shape: bf16[128,32], index: 5, kind: input, shape index: {}]   ;;  %s4771_s6 = inlined_call_operand.hbm [shape: f32[1,32], index: 6, kind: input, shape index: {}]   ;;  %s4772_s7 = inlined_call_operand.hbm [shape: bf16[32,128], index: 7, kind: input, shape index: {}]   ;;  %s4773_s8 = inlined_call_operand.hbm [shape: f32[1,128], index: 8, kind: input, shape index: {}]   ;;  %s4774_s9 = inlined_call_operand.hbm [shape: f32[8,128], index: 9, kind: output, shape index: {}]  }
   0x1   :  { %15 = vsyncpa [#allocation7], 0 }
   0x2   :  { %16 = vsyncpa [#allocation10], 0 }
   0x3   :  { %17 = vsyncpa [#allocation13], 0 }
   0x4   :  { %18 = vsyncpa [#allocation16], 0 }
   0x5   :  { %19 = vsyncpa [#allocation5], 0  ;;  %s4455_s30 = smov [#allocation6]   ;;  %s4245_s13 = scalar_lea.hbm %s4766_s1, 40960 }
   0x6   :  { %s35_s10 = sshll.u32 %s4455_s30, 4  ;;  %p4246_p0 = scmp.ne.s32.totalorder %s4766_s1, %s4245_s13  ;;  %s36_s10 = int_to_ptr.vmem [resolvable:$true] %s35_s10 }
   0x7   :  { %p4249_p1 = scmp.lt.u32.totalorder %s4245_s13, %s4766_s1 }
   0x9   :  { %p4251_p2 = pnand %p4249_p1, %p4246_p0 }
   0xb   :  { %4254 = shalt.err (!%p4251_p2)
}
   0xc   :  { %s4255_s18 = scalar_lea.vmem %s36_s10, 40960  ;;  %p4260_p4 = scmp.lt.s32.totalorder %s36_s10, %s36_s10 }
   0xd   :  { %p4256_p3 = scmp.ne.s32.totalorder %s36_s10, %s4255_s18  ;;  %p4261_p5 = scmp.lt.s32.totalorder %s4255_s18, %s4255_s18 }
   0xf   :  { %p4262_p6 = por %p4261_p5, %p4260_p4 }
  0x11   :  { %p4263_p7 = pnand %p4262_p6, %p4256_p3 }
  0x13   :  { %4266 = shalt.err (!%p4263_p7)
}
  0x14   :  { %s4456_s19 = smov 128   ;;  %s4457_s20 = smov 8  }
  0x15   :  { %41 = dma.hbm_to_vmem [thread:$0]  %s4766_s1, 40960, %s36_s10, [#allocation7], %s4456_s19, %s4456_s19, %s4457_s20  }
  0x16   :  { %s4458_s23 = smov [#allocation9]   ;;  %s4267_s27 = scalar_lea.hbm %s4768_s3, 2048 }
  0x17   :  { %s57_s24 = sshll.u32 %s4458_s23, 4  ;;  %p4268_p8 = scmp.ne.s32.totalorder %s4768_s3, %s4267_s27  ;;  %s58_s24 = int_to_ptr.vmem [resolvable:$true] %s57_s24 }
  0x18   :  { %p4271_p9 = scmp.lt.u32.totalorder %s4267_s27, %s4768_s3 }
  0x1a   :  { %p4273_p10 = pnand %p4271_p9, %p4268_p8 }
  0x1c   :  { %4276 = shalt.err (!%p4273_p10)
}
  0x1d   :  { %s4277_s12 = scalar_lea.vmem %s58_s24, 2048  ;;  %p4282_p12 = scmp.lt.s32.totalorder %s58_s24, %s58_s24 }
  0x1e   :  { %p4278_p11 = scmp.ne.s32.totalorder %s58_s24, %s4277_s12  ;;  %p4283_p13 = scmp.lt.s32.totalorder %s4277_s12, %s4277_s12 }
  0x20   :  { %p4284_p0 = por %p4283_p13, %p4282_p12 }
  0x22   :  { %p4285_p1 = pnand %p4284_p0, %p4278_p11 }
  0x24   :  { %4288 = shalt.err (!%p4285_p1)
}
  0x25   :  { %s4459_s1 = smov 64   ;;  %s4460_s10 = smov 4  }
  0x26   :  { %63 = dma.hbm_to_vmem [thread:$0]  %s4768_s3, 2048, %s58_s24, [#allocation10], %s4459_s1, %s4459_s1, %s4460_s10  }
  0x27   :  { %s4461_s15 = smov [#allocation12]   ;;  %s4462_s17 = smov [#allocation3]  }
  0x28   :  { %s82_s16 = sshll.u32 %s4461_s15, 4  ;;  %s26_s18 = sshll.u32 %s4462_s17, 4  ;;  %s83_s16 = int_to_ptr.vmem [resolvable:$true] %s82_s16  ;;  %s27_s18 = int_to_ptr.vmem [resolvable:$true] %s26_s18 }
  0x29   :  { %s4289_s21 = scalar_lea.hbm %s4771_s6, 16 }
  0x2a   :  { %p4290_p2 = scmp.ne.s32.totalorder %s4771_s6, %s4289_s21  ;;  %p4293_p3 = scmp.lt.u32.totalorder %s4289_s21, %s4771_s6 }
  0x2c   :  { %p4295_p4 = pnand %p4293_p3, %p4290_p2 }
  0x2e   :  { %4298 = shalt.err (!%p4295_p4)
}
  0x2f   :  { %s4299_s3 = scalar_lea.vmem %s83_s16, 16  ;;  %s4303_s24 = scalar_lea.vmem %s83_s16, 32 }
  0x30   :  { %p4300_p5 = scmp.ne.s32.totalorder %s83_s16, %s4299_s3  ;;  %p4304_p6 = scmp.lt.s32.totalorder %s83_s16, %s83_s16 }
  0x31   :  { %p4305_p7 = scmp.lt.s32.totalorder %s4303_s24, %s4299_s3 }
  0x33   :  { %p4306_p8 = por %p4305_p7, %p4304_p6 }
  0x35   :  { %p4307_p9 = pnand %p4306_p8, %p4300_p5 }
  0x37   :  { %4310 = shalt.err (!%p4307_p9)
}
  0x38   :  { %85 = dma.hbm_to_vmem [thread:$0]  %s4771_s6, 16, %s83_s16, [#allocation13]  }
  0x39   :  { %s4311_s11 = scalar_lea.hbm %s4765_s0, 128 }
  0x3a   :  { %p4312_p10 = scmp.ne.s32.totalorder %s4765_s0, %s4311_s11  ;;  %p4315_p11 = scmp.lt.u32.totalorder %s4311_s11, %s4765_s0 }
  0x3c   :  { %p4317_p12 = pnand %p4315_p11, %p4312_p10 }
  0x3e   :  { %4320 = shalt.err (!%p4317_p12)
}
  0x3f   :  { %s4321_s17 = scalar_lea.vmem %s27_s18, 128  ;;  %p4326_p0 = scmp.lt.s32.totalorder %s27_s18, %s27_s18 }
  0x40   :  { %p4322_p13 = scmp.ne.s32.totalorder %s27_s18, %s4321_s17  ;;  %p4327_p1 = scmp.lt.s32.totalorder %s4321_s17, %s4321_s17 }
  0x42   :  { %p4328_p2 = por %p4327_p1, %p4326_p0 }
  0x44   :  { %p4329_p3 = pnand %p4328_p2, %p4322_p13 }
  0x46   :  { %4332 = shalt.err (!%p4329_p3)
}
  0x47   :  { %29 = dma.hbm_to_vmem [thread:$0]  %s4765_s0, 128, %s27_s18, [#allocation4]  }
  0x48   :  { %s4463_s19 = smov [#allocation8]   ;;  %s4464_s21 = smov [#allocation11]  }
  0x49   :  { %s48_s20 = sshll.u32 %s4463_s19, 4  ;;  %s70_s22 = sshll.u32 %s4464_s21, 4  ;;  %s49_s20 = int_to_ptr.vmem [resolvable:$true] %s48_s20  ;;  %s71_s22 = int_to_ptr.vmem [resolvable:$true] %s70_s22 }
  0x4a   :  { %s4333_s26 = scalar_lea.hbm %s4767_s2, 32 }
  0x4b   :  { %p4334_p4 = scmp.ne.s32.totalorder %s4767_s2, %s4333_s26  ;;  %p4337_p5 = scmp.lt.u32.totalorder %s4333_s26, %s4767_s2 }
  0x4d   :  { %p4339_p6 = pnand %p4337_p5, %p4334_p4 }
  0x4f   :  { %4342 = shalt.err (!%p4339_p6)
}
  0x50   :  { %s4343_s0 = scalar_lea.vmem %s49_s20, 32  ;;  %p4348_p8 = scmp.lt.s32.totalorder %s49_s20, %s49_s20 }
  0x51   :  { %p4344_p7 = scmp.ne.s32.totalorder %s49_s20, %s4343_s0  ;;  %p4349_p9 = scmp.lt.s32.totalorder %s4343_s0, %s4343_s0 }
  0x53   :  { %p4350_p10 = por %p4349_p9, %p4348_p8 }
  0x55   :  { %p4351_p11 = pnand %p4350_p10, %p4344_p7 }
  0x57   :  { %4354 = shalt.err (!%p4351_p11)
}
  0x58   :  { %51 = dma.hbm_to_vmem [thread:$0]  %s4767_s2, 32, %s49_s20, [#allocation7]  }
  0x59   :  { %s4355_s12 = scalar_lea.hbm %s4769_s4, 16 }
  0x5a   :  { %p4356_p12 = scmp.ne.s32.totalorder %s4769_s4, %s4355_s12  ;;  %p4359_p13 = scmp.lt.u32.totalorder %s4355_s12, %s4769_s4 }
  0x5c   :  { %p4361_p0 = pnand %p4359_p13, %p4356_p12 }
  0x5e   :  { %4364 = shalt.err (!%p4361_p0)
}
  0x5f   :  { %s4365_s6 = scalar_lea.vmem %s71_s22, 16  ;;  %s4369_s16 = scalar_lea.vmem %s71_s22, 32 }
  0x60   :  { %p4366_p1 = scmp.ne.s32.totalorder %s71_s22, %s4365_s6  ;;  %p4370_p2 = scmp.lt.s32.totalorder %s71_s22, %s71_s22 }
  0x61   :  { %p4371_p3 = scmp.lt.s32.totalorder %s4369_s16, %s4365_s6 }
  0x63   :  { %p4372_p4 = por %p4371_p3, %p4370_p2 }
  0x65   :  { %p4373_p5 = pnand %p4372_p4, %p4366_p1 }
  0x67   :  { %4376 = shalt.err (!%p4373_p5)
}
  0x68   :  { %73 = dma.hbm_to_vmem [thread:$0]  %s4769_s4, 16, %s71_s22, [#allocation10]  }
  0x69   :  { %s4465_s20 = smov [#allocation14]   ;;  %s4466_s23 = smov [#allocation15]  }
  0x6a   :  { %s91_s21 = sshll.u32 %s4465_s20, 4  ;;  %s104_s25 = sshll.u32 %s4466_s23, 4  ;;  %s92_s21 = int_to_ptr.vmem [resolvable:$true] %s91_s21  ;;  %s105_s25 = int_to_ptr.vmem [resolvable:$true] %s104_s25 }
  0x6b   :  { %s4377_s24 = scalar_lea.hbm %s4772_s7, 256 }
  0x6c   :  { %p4378_p6 = scmp.ne.s32.totalorder %s4772_s7, %s4377_s24  ;;  %p4381_p7 = scmp.lt.u32.totalorder %s4377_s24, %s4772_s7 }
  0x6e   :  { %p4383_p8 = pnand %p4381_p7, %p4378_p6 }
  0x70   :  { %4386 = shalt.err (!%p4383_p8)
}
  0x71   :  { %s4387_s4 = scalar_lea.vmem %s92_s21, 256  ;;  %p4392_p10 = scmp.lt.s32.totalorder %s92_s21, %s92_s21 }
  0x72   :  { %p4388_p9 = scmp.ne.s32.totalorder %s92_s21, %s4387_s4  ;;  %p4393_p11 = scmp.lt.s32.totalorder %s4387_s4, %s4387_s4 }
  0x74   :  { %p4394_p12 = por %p4393_p11, %p4392_p10 }
  0x76   :  { %p4395_p13 = pnand %p4394_p12, %p4388_p9 }
  0x78   :  { %4398 = shalt.err (!%p4395_p13)
}
  0x79   :  { %97 = dma.hbm_to_vmem [thread:$0]  %s4772_s7, 256, %s92_s21, [#allocation13], %s4459_s1, %s4459_s1, %s4460_s10  }
  0x7a   :  { %s4399_s12 = scalar_lea.hbm %s4773_s8, 16 }
  0x7b   :  { %p4400_p0 = scmp.ne.s32.totalorder %s4773_s8, %s4399_s12  ;;  %p4403_p1 = scmp.lt.u32.totalorder %s4399_s12, %s4773_s8 }
  0x7d   :  { %p4405_p2 = pnand %p4403_p1, %p4400_p0 }
  0x7f   :  { %4408 = shalt.err (!%p4405_p2)
}
  0x80   :  { %s4409_s6 = scalar_lea.vmem %s105_s25, 16  ;;  %s4413_s16 = scalar_lea.vmem %s105_s25, 32 }
  0x81   :  { %p4410_p3 = scmp.ne.s32.totalorder %s105_s25, %s4409_s6  ;;  %p4414_p4 = scmp.lt.s32.totalorder %s105_s25, %s105_s25 }
  0x82   :  { %p4415_p5 = scmp.lt.s32.totalorder %s4413_s16, %s4409_s6 }
  0x84   :  { %p4416_p6 = por %p4415_p5, %p4414_p4 }
  0x86   :  { %p4417_p7 = pnand %p4416_p6, %p4410_p3 }
  0x88   :  { %4420 = shalt.err (!%p4417_p7)
}
  0x89   :  { %107 = dma.hbm_to_vmem [thread:$0]  %s4773_s8, 16, %s105_s25, [#allocation16]  }
  0x8a   :  { %4443 = dma.done.wait [#allocation4], 128  }
  0x8b   :  { %4444 = vsyncadd [#allocation4], 4294967168 }
  0x8c   :  { %4445 = dma.done.wait [#allocation7], 40992  }
  0x8d   :  { %4446 = vsyncadd [#allocation7], 4294926304 }
  0x8e   :  { %4447 = dma.done.wait [#allocation10], 2064  }
  0x8f   :  { %4448 = vsyncadd [#allocation10], 4294965232 }
  0x90   :  { %4449 = dma.done.wait [#allocation13], 272  }
  0x91   :  { %4450 = vsyncadd [#allocation13], 4294967024 }
  0x92   :  { %4451 = dma.done.wait [#allocation16], 16  }
  0x93   :  { %4452 = vsyncadd [#allocation16], 4294967280  ;;  %v4467_v0 = vmov 4   ;;  %v4468_v1 = vmov 0   ;;  %v4633_v2 = vld [vmem:[#allocation3] sm:$0xff]  ;;  %v4469_v9 = vmov 6  }
  0x94   :  { %3723 = vset.pattern.permute.xlu0 %v4467_v0  ;;  %3725 = vset.pattern.permute.xlu1 %v4468_v1  ;;  %v3734_v3 = vld [vmem:[#allocation6 + $0x4] ss:$8 sps:$4 sm:$0xff]   ;;  %v3738_v5 = vld [vmem:[#allocation6] ss:$8 sps:$4 sm:$0xff]   ;;  %v3740_v7 = vld [vmem:[#allocation6 + $0x14] ss:$8 sps:$4 sm:$0xff]  }
  0x95   :  { %138 = vperm.xlu1 %3725, %v4633_v2   ;;  %210 = vperm.xlu0 %3723, %v4633_v2   ;;  %v3736_v4 = vld [vmem:[#allocation6 + $0x404] ss:$8 sps:$4 sm:$0xff]   ;;  %v3739_v6 = vld [vmem:[#allocation6 + $0x400] ss:$8 sps:$4 sm:$0xff]   ;;  %v3742_v8 = vld [vmem:[#allocation6 + $0x414] ss:$8 sps:$4 sm:$0xff]  }
  0x96   :  { %2329 = vmatprep.subr.bf16.mxu1 %v3734_v3  ;;  %2493 = vmatprep.subr.bf16.mxu0 %v3736_v4  ;;  %v4470_v10 = vmov 5   ;;  %v3744_v11 = vld [vmem:[#allocation6 + $0x10] ss:$8 sps:$4 sm:$0xff]   ;;  %v3746_v12 = vld [vmem:[#allocation6 + $0x24] ss:$8 sps:$4 sm:$0xff]   ;;  %v4471_v17 = vmov 1  }
  0x97   :  { %2330 = vmatpush1.bf16.msra.mxu1 %v3738_v5  ;;  %2494 = vmatpush1.bf16.msra.mxu0 %v3739_v6  ;;  %v3745_v13 = vld [vmem:[#allocation6 + $0x410] ss:$8 sps:$4 sm:$0xff]   ;;  %v3748_v14 = vld [vmem:[#allocation6 + $0x424] ss:$8 sps:$4 sm:$0xff]   ;;  %v3750_v15 = vld [vmem:[#allocation6 + $0x20] ss:$8 sps:$4 sm:$0xff]  }
  0x98   :  { %2331 = vmatprep.subr.bf16.mxu1 %v3740_v7  ;;  %2495 = vmatprep.subr.bf16.mxu0 %v3742_v8  ;;  %v3752_v16 = vld [vmem:[#allocation6 + $0x34] ss:$8 sps:$4 sm:$0xff]   ;;  %v3751_v18 = vld [vmem:[#allocation6 + $0x420] ss:$8 sps:$4 sm:$0xff]   ;;  %v3756_v20 = vld [vmem:[#allocation6 + $0x30] ss:$8 sps:$4 sm:$0xff]  }
  0x99   :  { %3726 = vset.pattern.permute.xlu1 %v4469_v9  ;;  %3724 = vset.pattern.permute.xlu0 %v4470_v10  ;;  %v3754_v19 = vld [vmem:[#allocation6 + $0x434] ss:$8 sps:$4 sm:$0xff]   ;;  %v3758_v21 = vld [vmem:[#allocation6 + $0x44] ss:$8 sps:$4 sm:$0xff]   ;;  %v3757_v22 = vld [vmem:[#allocation6 + $0x430] ss:$8 sps:$4 sm:$0xff]  }
  0x9a   :  { %246 = vperm.xlu1 %3726, %v4633_v2   ;;  %228 = vperm.xlu0 %3724, %v4633_v2   ;;  %v3760_v23 = vld [vmem:[#allocation6 + $0x444] ss:$8 sps:$4 sm:$0xff]   ;;  %v4472_v24 = vmov 2   ;;  %v3762_v25 = vld [vmem:[#allocation6 + $0x40] ss:$8 sps:$4 sm:$0xff]   ;;  %v4473_v8 = vmov 7  }
  0x9b   :  { %2332 = vmatpush1.bf16.msra.mxu1 %v3744_v11  ;;  %2496 = vmatpush1.bf16.msra.mxu0 %v3745_v13  ;;  %v3764_v26 = vld [vmem:[#allocation6 + $0x54] ss:$8 sps:$4 sm:$0xff]   ;;  %v3763_v27 = vld [vmem:[#allocation6 + $0x440] ss:$8 sps:$4 sm:$0xff]   ;;  %v3768_v29 = vld [vmem:[#allocation6 + $0x50] ss:$8 sps:$4 sm:$0xff]  }
  0x9c   :  { %2333 = vmatprep.subr.bf16.mxu1 %v3746_v12  ;;  %2497 = vmatprep.subr.bf16.mxu0 %v3748_v14  ;;  %v3766_v28 = vld [vmem:[#allocation6 + $0x454] ss:$8 sps:$4 sm:$0xff]   ;;  %v3770_v30 = vld [vmem:[#allocation6 + $0x64] ss:$8 sps:$4 sm:$0xff]   ;;  %v3769_v31 = vld [vmem:[#allocation6 + $0x450] ss:$8 sps:$4 sm:$0xff]   ;;  %v134_v12 = vlaneseq }
  0x9d   :  { %v3772_v32 = vld [vmem:[#allocation6 + $0x464] ss:$8 sps:$4 sm:$0xff]   ;;  %v3774_v33 = vld [vmem:[#allocation6 + $0x60] ss:$8 sps:$4 sm:$0xff]   ;;  %v3776_v34 = vld [vmem:[#allocation6 + $0x74] ss:$8 sps:$4 sm:$0xff]  }
  0x9e   :  { %3727 = vset.pattern.permute.xlu1 %v4471_v17  ;;  %v3775_v35 = vld [vmem:[#allocation6 + $0x460] ss:$8 sps:$4 sm:$0xff]   ;;  %v3778_v36 = vld [vmem:[#allocation6 + $0x474] ss:$8 sps:$4 sm:$0xff]   ;;  %v3780_v37 = vld [vmem:[#allocation6 + $0x70] ss:$8 sps:$4 sm:$0xff]   ;;  %3728 = vset.pattern.permute.xlu0 %v4473_v8 }
  0x9f   :  { %156 = vperm.xlu1 %3727, %v4633_v2   ;;  %2334 = vmatpush1.bf16.msra.mxu1 %v3750_v15  ;;  %v3782_v38 = vld [vmem:[#allocation6 + $0x84] ss:$8 sps:$4 sm:$0xff]   ;;  %v3781_v39 = vld [vmem:[#allocation6 + $0x470] ss:$8 sps:$4 sm:$0xff]   ;;  %v3786_v41 = vld [vmem:[#allocation6 + $0x80] ss:$8 sps:$4 sm:$0xff]  }
  0xa0   :  { %2335 = vmatprep.subr.bf16.mxu1 %v3752_v16  ;;  %2498 = vmatpush1.bf16.msra.mxu0 %v3751_v18  ;;  %v3784_v40 = vld [vmem:[#allocation6 + $0x484] ss:$8 sps:$4 sm:$0xff]   ;;  %v3788_v42 = vld [vmem:[#allocation6 + $0x94] ss:$8 sps:$4 sm:$0xff]   ;;  %v3787_v43 = vld [vmem:[#allocation6 + $0x480] ss:$8 sps:$4 sm:$0xff]  }
  0xa1   :  { %2499 = vmatprep.subr.bf16.mxu0 %v3754_v19  ;;  %v3790_v44 = vld [vmem:[#allocation6 + $0x494] ss:$8 sps:$4 sm:$0xff]   ;;  %v3792_v45 = vld [vmem:[#allocation6 + $0x90] ss:$8 sps:$4 sm:$0xff]   ;;  %v3794_v46 = vld [vmem:[#allocation6 + $0xa4] ss:$8 sps:$4 sm:$0xff]   ;;  %264 = vperm.xlu0 %3728, %v4633_v2  }
  0xa2   :  { %v3793_v47 = vld [vmem:[#allocation6 + $0x490] ss:$8 sps:$4 sm:$0xff]   ;;  %v3796_v48 = vld [vmem:[#allocation6 + $0x4a4] ss:$8 sps:$4 sm:$0xff]   ;;  %v3798_v49 = vld [vmem:[#allocation6 + $0xa0] ss:$8 sps:$4 sm:$0xff]  }
  0xa3   :  { %3729 = vset.pattern.permute.xlu1 %v4472_v24  ;;  %2336 = vmatpush1.bf16.msra.mxu1 %v3756_v20  ;;  %v3800_v50 = vld [vmem:[#allocation6 + $0xb4] ss:$8 sps:$4 sm:$0xff]   ;;  %v3799_v51 = vld [vmem:[#allocation6 + $0x4a0] ss:$8 sps:$4 sm:$0xff]   ;;  %v3804_v53 = vld [vmem:[#allocation6 + $0xb0] ss:$8 sps:$4 sm:$0xff]  }
  0xa4   :  { %2337 = vmatprep.subr.bf16.mxu1 %v3758_v21  ;;  %174 = vperm.xlu1 %3729, %v4633_v2   ;;  %v3802_v52 = vld [vmem:[#allocation6 + $0x4b4] ss:$8 sps:$4 sm:$0xff]   ;;  %v3806_v54 = vld [vmem:[#allocation6 + $0xc4] ss:$8 sps:$4 sm:$0xff]   ;;  %v3805_v55 = vld [vmem:[#allocation6 + $0x4b0] ss:$8 sps:$4 sm:$0xff]  }
  0xa5   :  { %2500 = vmatpush1.bf16.msra.mxu0 %v3757_v22  ;;  %v3808_v56 = vld [vmem:[#allocation6 + $0x4c4] ss:$8 sps:$4 sm:$0xff]   ;;  %v3810_v57 = vld [vmem:[#allocation6 + $0xc0] ss:$8 sps:$4 sm:$0xff]   ;;  %v3812_v58 = vld [vmem:[#allocation6 + $0xd4] ss:$8 sps:$4 sm:$0xff]  }
  0xa6   :  { %2501 = vmatprep.subr.bf16.mxu0 %v3760_v23  ;;  %v3811_v59 = vld [vmem:[#allocation6 + $0x4c0] ss:$8 sps:$4 sm:$0xff]   ;;  %v3814_v60 = vld [vmem:[#allocation6 + $0x4d4] ss:$8 sps:$4 sm:$0xff]   ;;  %v3816_v61 = vld [vmem:[#allocation6 + $0xd0] ss:$8 sps:$4 sm:$0xff]  }
  0xa7   :  { %2338 = vmatpush1.bf16.msra.mxu1 %v3762_v25  ;;  %v3818_v62 = vld [vmem:[#allocation6 + $0xe4] ss:$8 sps:$4 sm:$0xff]   ;;  %v3817_v63 = vld [vmem:[#allocation6 + $0x4d0] ss:$8 sps:$4 sm:$0xff]   ;;  %v3822_v1 = vld [vmem:[#allocation6 + $0xe0] ss:$8 sps:$4 sm:$0xff]  }
  0xa8   :  { %2339 = vmatprep.subr.bf16.mxu1 %v3764_v26  ;;  %v3820_v0 = vld [vmem:[#allocation6 + $0x4e4] ss:$8 sps:$4 sm:$0xff]   ;;  %v3824_v3 = vld [vmem:[#allocation6 + $0xf4] ss:$8 sps:$4 sm:$0xff]   ;;  %v3823_v4 = vld [vmem:[#allocation6 + $0x4e0] ss:$8 sps:$4 sm:$0xff]  }
  0xa9   :  { %2502 = vmatpush1.bf16.msra.mxu0 %v3763_v27  ;;  %v3826_v5 = vld [vmem:[#allocation6 + $0x4f4] ss:$8 sps:$4 sm:$0xff]   ;;  %v3828_v6 = vld [vmem:[#allocation6 + $0xf0] ss:$8 sps:$4 sm:$0xff]   ;;  %v3832_v7 = vld [vmem:[#allocation6 + $0x104] ss:$8 sps:$4 sm:$0xff]  }
  0xaa   :  { %2503 = vmatprep.subr.bf16.mxu0 %v3766_v28  ;;  %v3829_v9 = vld [vmem:[#allocation6 + $0x4f0] ss:$8 sps:$4 sm:$0xff]   ;;  %v3835_v10 = vld [vmem:[#allocation6 + $0x504] ss:$8 sps:$4 sm:$0xff]   ;;  %v4474_v11 = vmov 3   ;;  %v4644_v13 = vand.u32 127, %v134_v12 }
  0xab   :  { %2340 = vmatpush1.bf16.msra.mxu1 %v3768_v29  ;;  %3731 = vset.pattern.permute.xlu0 %v4474_v11  ;;  %v3830_v17 = vld [vmem:[#allocation6 + $0x100] ss:$8 sps:$4 sm:$0xff]   ;;  %v4475_v18 = vmov 8   ;;  %v3838_v20 = vld [vmem:[#allocation6 + $0x114] ss:$8 sps:$4 sm:$0xff]  }
  0xac   :  { %2341 = vmatprep.subr.bf16.mxu1 %v3770_v30  ;;  %192 = vperm.xlu0 %3731, %v4633_v2   ;;  %v4647_v14 = vadd.s32 128, %v4644_v13  ;;  %v3833_v19 = vld [vmem:[#allocation6 + $0x500] ss:$8 sps:$4 sm:$0xff]   ;;  %v4476_v21 = vmov 1.0|1.0  }
  0xad   :  { %2504 = vmatpush1.bf16.msra.mxu0 %v3769_v31  ;;  %3730 = vset.pattern.permute.xlu1 %v4475_v18  ;;  %v3841_v22 = vld [vmem:[#allocation6 + $0x514] ss:$8 sps:$4 sm:$0xff]   ;;  %v3839_v25 = vld [vmem:[#allocation6 + $0x510] ss:$8 sps:$4 sm:$0xff]   ;;  %v3844_v26 = vld [vmem:[#allocation6 + $0x124] ss:$8 sps:$4 sm:$0xff]  }
  0xae   :  { %2505 = vmatprep.subr.bf16.mxu0 %v3772_v32  ;;  %282 = vperm.xlu1 %3730, %v4633_v2   ;;  %v3836_v2 = vld [vmem:[#allocation6 + $0x110] ss:$8 sps:$4 sm:$0xff]   ;;  %v3847_v27 = vld [vmem:[#allocation6 + $0x524] ss:$8 sps:$4 sm:$0xff]   ;;  %v3842_v28 = vld [vmem:[#allocation6 + $0x120] ss:$8 sps:$4 sm:$0xff]  }
  0xaf   :  { %2342 = vmatpush1.bf16.msra.mxu1 %v3774_v33  ;;  %v3845_v30 = vld [vmem:[#allocation6 + $0x520] ss:$8 sps:$4 sm:$0xff]   ;;  %v3850_v31 = vld [vmem:[#allocation6 + $0x134] ss:$8 sps:$4 sm:$0xff]   ;;  %v3848_v32 = vld [vmem:[#allocation6 + $0x130] ss:$8 sps:$4 sm:$0xff]  }
  0xb0   :  { %2343 = vmatprep.subr.bf16.mxu1 %v3776_v34  ;;  %v3853_v33 = vld [vmem:[#allocation6 + $0x534] ss:$8 sps:$4 sm:$0xff]   ;;  %v3851_v34 = vld [vmem:[#allocation6 + $0x530] ss:$8 sps:$4 sm:$0xff]   ;;  %v3917_v18 = vld [vmem:[#allocation6 + $0x5e0] ss:$8 sps:$4 sm:$0xff]  }
  0xb1   :  { %2506 = vmatpush1.bf16.msra.mxu0 %v3775_v35  ;;  %v3856_v35 = vld [vmem:[#allocation6 + $0x144] ss:$8 sps:$4 sm:$0xff]   ;;  %v3910_v8 = vld [vmem:[#allocation6 + $0x1d4] ss:$8 sps:$4 sm:$0xff]   ;;  %v3911_v11 = vld [vmem:[#allocation6 + $0x5d0] ss:$8 sps:$4 sm:$0xff]  }
  0xb2   :  { %2507 = vmatprep.subr.bf16.mxu0 %v3778_v36  ;;  %v3859_v36 = vld [vmem:[#allocation6 + $0x544] ss:$8 sps:$4 sm:$0xff]  }
  0xb3   :  { %2344 = vmatpush1.bf16.msra.mxu1 %v3780_v37  ;;  %v3854_v37 = vld [vmem:[#allocation6 + $0x140] ss:$8 sps:$4 sm:$0xff]  }
  0xb4   :  { %2345 = vmatprep.subr.bf16.mxu1 %v3782_v38  ;;  %v3857_v38 = vld [vmem:[#allocation6 + $0x540] ss:$8 sps:$4 sm:$0xff]  }
  0xb5   :  { %2508 = vmatpush1.bf16.msra.mxu0 %v3781_v39  ;;  %v3862_v39 = vld [vmem:[#allocation6 + $0x154] ss:$8 sps:$4 sm:$0xff]  }
  0xb6   :  { %2509 = vmatprep.subr.bf16.mxu0 %v3784_v40  ;;  %v3860_v40 = vld [vmem:[#allocation6 + $0x150] ss:$8 sps:$4 sm:$0xff]  }
  0xb7   :  { %2346 = vmatpush1.bf16.msra.mxu1 %v3786_v41  ;;  %v3865_v41 = vld [vmem:[#allocation6 + $0x554] ss:$8 sps:$4 sm:$0xff]  }
  0xb8   :  { %2347 = vmatprep.subr.bf16.mxu1 %v3788_v42  ;;  %v3863_v42 = vld [vmem:[#allocation6 + $0x550] ss:$8 sps:$4 sm:$0xff]  }
  0xb9   :  { %2510 = vmatpush1.bf16.msra.mxu0 %v3787_v43  ;;  %v3868_v43 = vld [vmem:[#allocation6 + $0x164] ss:$8 sps:$4 sm:$0xff]  }
  0xba   :  { %2511 = vmatprep.subr.bf16.mxu0 %v3790_v44  ;;  %v3866_v44 = vld [vmem:[#allocation6 + $0x160] ss:$8 sps:$4 sm:$0xff]  }
  0xbb   :  { %2348 = vmatpush1.bf16.msra.mxu1 %v3792_v45  ;;  %v3871_v45 = vld [vmem:[#allocation6 + $0x564] ss:$8 sps:$4 sm:$0xff]  }
  0xbc   :  { %2349 = vmatprep.subr.bf16.mxu1 %v3794_v46  ;;  %v3869_v46 = vld [vmem:[#allocation6 + $0x560] ss:$8 sps:$4 sm:$0xff]  }
  0xbd   :  { %2512 = vmatpush1.bf16.msra.mxu0 %v3793_v47  ;;  %v3874_v47 = vld [vmem:[#allocation6 + $0x174] ss:$8 sps:$4 sm:$0xff]  }
  0xbe   :  { %2513 = vmatprep.subr.bf16.mxu0 %v3796_v48  ;;  %v3872_v48 = vld [vmem:[#allocation6 + $0x170] ss:$8 sps:$4 sm:$0xff]  }
  0xbf   :  { %2350 = vmatpush1.bf16.msra.mxu1 %v3798_v49  ;;  %v3877_v49 = vld [vmem:[#allocation6 + $0x574] ss:$8 sps:$4 sm:$0xff]  }
  0xc0   :  { %2351 = vmatprep.subr.bf16.mxu1 %v3800_v50  ;;  %v3875_v50 = vld [vmem:[#allocation6 + $0x570] ss:$8 sps:$4 sm:$0xff]  }
  0xc1   :  { %2514 = vmatpush1.bf16.msra.mxu0 %v3799_v51  ;;  %v3880_v51 = vld [vmem:[#allocation6 + $0x184] ss:$8 sps:$4 sm:$0xff]  }
  0xc2   :  { %2515 = vmatprep.subr.bf16.mxu0 %v3802_v52  ;;  %v3878_v52 = vld [vmem:[#allocation6 + $0x180] ss:$8 sps:$4 sm:$0xff]  }
  0xc3   :  { %2352 = vmatpush1.bf16.msra.mxu1 %v3804_v53  ;;  %v3883_v53 = vld [vmem:[#allocation6 + $0x584] ss:$8 sps:$4 sm:$0xff]  }
  0xc4   :  { %2353 = vmatprep.subr.bf16.mxu1 %v3806_v54  ;;  %v3881_v54 = vld [vmem:[#allocation6 + $0x580] ss:$8 sps:$4 sm:$0xff]  }
  0xc5   :  { %2516 = vmatpush1.bf16.msra.mxu0 %v3805_v55  ;;  %v3886_v55 = vld [vmem:[#allocation6 + $0x194] ss:$8 sps:$4 sm:$0xff]  }
  0xc6   :  { %2517 = vmatprep.subr.bf16.mxu0 %v3808_v56  ;;  %v3884_v56 = vld [vmem:[#allocation6 + $0x190] ss:$8 sps:$4 sm:$0xff]  }
  0xc7   :  { %2354 = vmatpush1.bf16.msra.mxu1 %v3810_v57  ;;  %v3889_v57 = vld [vmem:[#allocation6 + $0x594] ss:$8 sps:$4 sm:$0xff]  }
  0xc8   :  { %2355 = vmatprep.subr.bf16.mxu1 %v3812_v58  ;;  %v3887_v58 = vld [vmem:[#allocation6 + $0x590] ss:$8 sps:$4 sm:$0xff]  }
  0xc9   :  { %2518 = vmatpush1.bf16.msra.mxu0 %v3811_v59  ;;  %v3892_v59 = vld [vmem:[#allocation6 + $0x1a4] ss:$8 sps:$4 sm:$0xff]  }
  0xca   :  { %2519 = vmatprep.subr.bf16.mxu0 %v3814_v60  ;;  %v3890_v60 = vld [vmem:[#allocation6 + $0x1a0] ss:$8 sps:$4 sm:$0xff]  }
  0xcb   :  { %2356 = vmatpush1.bf16.msra.mxu1 %v3816_v61  ;;  %v3895_v61 = vld [vmem:[#allocation6 + $0x5a4] ss:$8 sps:$4 sm:$0xff]  }
  0xcc   :  { %2357 = vmatprep.subr.bf16.mxu1 %v3818_v62  ;;  %v3893_v62 = vld [vmem:[#allocation6 + $0x5a0] ss:$8 sps:$4 sm:$0xff]  }
  0xcd   :  { %2520 = vmatpush1.bf16.msra.mxu0 %v3817_v63  ;;  %v3898_v63 = vld [vmem:[#allocation6 + $0x1b4] ss:$8 sps:$4 sm:$0xff]  }
  0xce   :  { %2521 = vmatprep.subr.bf16.mxu0 %v3820_v0  ;;  %v3896_v0 = vld [vmem:[#allocation6 + $0x1b0] ss:$8 sps:$4 sm:$0xff]  }
  0xcf   :  { %2358 = vmatpush1.bf16.msra.mxu1 %v3822_v1  ;;  %v3901_v1 = vld [vmem:[#allocation6 + $0x5b4] ss:$8 sps:$4 sm:$0xff]  }
  0xd0   :  { %2359 = vmatprep.subr.bf16.mxu1 %v3824_v3  ;;  %v3899_v3 = vld [vmem:[#allocation6 + $0x5b0] ss:$8 sps:$4 sm:$0xff]  }
  0xd1   :  { %2522 = vmatpush1.bf16.msra.mxu0 %v3823_v4  ;;  %v3904_v4 = vld [vmem:[#allocation6 + $0x1c4] ss:$8 sps:$4 sm:$0xff]  }
  0xd2   :  { %2523 = vmatprep.subr.bf16.mxu0 %v3826_v5  ;;  %v3902_v5 = vld [vmem:[#allocation6 + $0x1c0] ss:$8 sps:$4 sm:$0xff]  }
  0xd3   :  { %2360 = vmatpush1.bf16.msra.mxu1 %v3828_v6  ;;  %v3907_v6 = vld [vmem:[#allocation6 + $0x5c4] ss:$8 sps:$4 sm:$0xff]  }
  0xd4   :  { %2370 = vmatprep.subr.bf16.mxu1 %v3832_v7  ;;  %v3905_v7 = vld [vmem:[#allocation6 + $0x5c0] ss:$8 sps:$4 sm:$0xff]  }
  0xd5   :  { %2524 = vmatpush1.bf16.msra.mxu0 %v3829_v9  ;;  %v3908_v9 = vld [vmem:[#allocation6 + $0x1d0] ss:$8 sps:$4 sm:$0xff]  }
  0xd6   :  { %2534 = vmatprep.subr.bf16.mxu0 %v3835_v10  ;;  %v3913_v10 = vld [vmem:[#allocation6 + $0x5d4] ss:$8 sps:$4 sm:$0xff]  }
 0x114   :  { %v139_v15 = vpop.permute.xlu1 %138  ;;  %v211_v16 = vpop.permute.xlu0 %210 }
 0x115   :  { %vm140_vm0 = vcmp.eq.s32.totalorder %v139_v15, %v4644_v13  ;;  %vm212_vm1 = vcmp.eq.s32.totalorder %v211_v16, %v4644_v13  ;;  %vm141_vm2 = vcmp.eq.s32.totalorder %v139_v15, %v4647_v14  ;;  %vm213_vm4 = vcmp.eq.s32.totalorder %v211_v16, %v4647_v14  ;;  %v3916_v15 = vld [vmem:[#allocation6 + $0x1e4] ss:$8 sps:$4 sm:$0xff]   ;;  %v3914_v16 = vld [vmem:[#allocation6 + $0x1e0] ss:$8 sps:$4 sm:$0xff]  }
 0x116   :  { %vm3561_vm3 = vmpackc.low %vm140_vm0, %vm140_vm0 }
 0x117   :  { %vm3577_vm5 = vmpackc.low %vm212_vm1, %vm212_vm1 }
 0x118   :  { %vm3559_vm6 = vmpackc.low %vm141_vm2, %vm141_vm2 }
 0x119   :  { %3560 = vmatprep.mubr.msk.bf16.mxu1 %vm3559_vm6, %v4476_v21  ;;  %vm3575_vm7 = vmpackc.low %vm213_vm4, %vm213_vm4  ;;  %v4655_v23 = vpop.permute.xlu1 %246  ;;  %v4657_v24 = vpop.permute.xlu0 %228 }
 0x11a   :  { %3576 = vmatprep.mubr.msk.bf16.mxu0 %vm3575_vm7, %v4476_v21  ;;  %3562 = vmatmul.mubr.msk.bf16.vlgmr.msra.gmra.mrb[0].mxu1 %vm3561_vm3, %v4476_v21  ;;  %vm231_vm8 = vcmp.eq.s32.totalorder %v4657_v24, %v4647_v14  ;;  %vm230_vm13 = vcmp.eq.s32.totalorder %v4657_v24, %v4644_v13  ;;  %vm249_vm15 = vcmp.eq.s32.totalorder %v4655_v23, %v4647_v14  ;;  %v3932_v24 = vld [vmem:[#allocation6 + $0x210] ss:$8 sps:$4 sm:$0xff]  }
 0x11b   :  { %2371 = vmatpush1.bf16.msra.mxu1 %v3830_v17  ;;  %3578 = vmatmul.mubr.msk.bf16.vlgmr.msra.gmra.mrb[0].mxu0 %vm3577_vm5, %v4476_v21  ;;  %vm3579_vm9 = vmpackc.low %vm231_vm8, %vm231_vm8  ;;  %v3919_v17 = vld [vmem:[#allocation6 + $0x5e4] ss:$8 sps:$4 sm:$0xff]   ;;  %vm248_vm5 = vcmp.eq.s32.totalorder %v4655_v23, %v4644_v13  ;;  %v4028_v23 = vld [vmem:[#allocation6 + $0x310] ss:$8 sps:$4 sm:$0xff]  }
 0x11c   :  { %2535 = vmatpush1.bf16.msra.mxu0 %v3833_v19  ;;  %2372 = vmatprep.subr.bf16.mxu1 %v3838_v20  ;;  %v3922_v19 = vld [vmem:[#allocation6 + $0x1f4] ss:$8 sps:$4 sm:$0xff]   ;;  %vm3581_vm1 = vmpackc.low %vm230_vm13, %vm230_vm13 }
 0x11d   :  { %2536 = vmatprep.subr.bf16.mxu0 %v3841_v22  ;;  %3580 = vmatprep.mubr.msk.bf16.mxu0 %vm3579_vm9, %v4476_v21  ;;  %v3925_v20 = vld [vmem:[#allocation6 + $0x5f4] ss:$8 sps:$4 sm:$0xff]   ;;  %v3920_v22 = vld [vmem:[#allocation6 + $0x1f0] ss:$8 sps:$4 sm:$0xff]   ;;  %vm3583_vm2 = vmpackc.low %vm249_vm15, %vm249_vm15 }
 0x11e   :  { %v4664_v29 = vpop.permute.xlu1 %156  ;;  %vm3585_vm8 = vmpackc.low %vm248_vm5, %vm248_vm5 }
 0x11f   :  { %2373 = vmatpush1.bf16.msra.mxu1 %v3836_v2  ;;  %vm159_vm10 = vcmp.eq.s32.totalorder %v4664_v29, %v4647_v14  ;;  %vm158_vm12 = vcmp.eq.s32.totalorder %v4664_v29, %v4644_v13  ;;  %v3923_v2 = vld [vmem:[#allocation6 + $0x5f0] ss:$8 sps:$4 sm:$0xff]   ;;  %v3929_v29 = vld [vmem:[#allocation6 + $0x600] ss:$8 sps:$4 sm:$0xff]  }
 0x120   :  { %2537 = vmatpush1.bf16.msra.mxu0 %v3839_v25  ;;  %2374 = vmatprep.subr.bf16.mxu1 %v3844_v26  ;;  %vm3563_vm11 = vmpackc.low %vm159_vm10, %vm159_vm10  ;;  %v3928_v25 = vld [vmem:[#allocation6 + $0x204] ss:$8 sps:$4 sm:$0xff]  }
 0x121   :  { %2538 = vmatprep.subr.bf16.mxu0 %v3847_v27  ;;  %3564 = vmatprep.mubr.msk.bf16.mxu1 %vm3563_vm11, %v4476_v21  ;;  %vm4676_vm14 = vmpackc.low %vm158_vm12, %vm158_vm12  ;;  %v4012_v27 = vld [vmem:[#allocation6 + $0x2e4] ss:$8 sps:$4 sm:$0xff]  }
 0x123   :  { %2375 = vmatpush1.bf16.msra.mxu1 %v3842_v28  ;;  %v4672_v26 = vpop.permute.xlu1 %174  ;;  %v3926_v28 = vld [vmem:[#allocation6 + $0x200] ss:$8 sps:$4 sm:$0xff]  }
 0x124   :  { %2539 = vmatpush1.bf16.msra.mxu0 %v3845_v30  ;;  %2376 = vmatprep.subr.bf16.mxu1 %v3850_v31  ;;  %v3931_v30 = vld [vmem:[#allocation6 + $0x604] ss:$8 sps:$4 sm:$0xff]   ;;  %v4477_v31 = vmov 9   ;;  %vm177_vm0 = vcmp.eq.s32.totalorder %v4672_v26, %v4647_v14  ;;  %vm176_vm4 = vcmp.eq.s32.totalorder %v4672_v26, %v4644_v13  ;;  %v4033_v26 = vld [vmem:[#allocation6 + $0x714] ss:$8 sps:$4 sm:$0xff]  }
 0x125   :  { %2540 = vmatprep.subr.bf16.mxu0 %v3853_v33  ;;  %3732 = vset.pattern.permute.xlu1 %v4477_v31  ;;  %v4244_v33 = vld [vmem:[#allocation3] sm:$0xff]  ;;  %vm3567_vm3 = vmpackc.low %vm177_vm0, %vm177_vm0 }
 0x126   :  { %300 = vperm.xlu1 %3732, %v4244_v33   ;;  %3733 = vset.pattern.permute.xlu0 %v4477_v31  ;;  %v4010_v31 = vld [vmem:[#allocation6 + $0x2e0] ss:$8 sps:$4 sm:$0xff]   ;;  %v4021_v33 = vld [vmem:[#allocation6 + $0x6f4] ss:$8 sps:$4 sm:$0xff]   ;;  %vm3569_vm6 = vmpackc.low %vm176_vm4, %vm176_vm4 }
 0x127   :  { %2377 = vmatpush1.bf16.msra.mxu1 %v3848_v32  ;;  %v3934_v32 = vld [vmem:[#allocation6 + $0x214] ss:$8 sps:$4 sm:$0xff]  }
 0x128   :  { %2541 = vmatpush1.bf16.msra.mxu0 %v3851_v34  ;;  %2378 = vmatprep.subr.bf16.mxu1 %v3856_v35  ;;  %v3937_v34 = vld [vmem:[#allocation6 + $0x614] ss:$8 sps:$4 sm:$0xff]   ;;  %v3935_v35 = vld [vmem:[#allocation6 + $0x610] ss:$8 sps:$4 sm:$0xff]  }
 0x129   :  { %2542 = vmatprep.subr.bf16.mxu0 %v3859_v36  ;;  %v3940_v36 = vld [vmem:[#allocation6 + $0x224] ss:$8 sps:$4 sm:$0xff]  }
 0x12b   :  { %2379 = vmatpush1.bf16.msra.mxu1 %v3854_v37  ;;  %v3943_v37 = vld [vmem:[#allocation6 + $0x624] ss:$8 sps:$4 sm:$0xff]  }
 0x12c   :  { %2543 = vmatpush1.bf16.msra.mxu0 %v3857_v38  ;;  %2380 = vmatprep.subr.bf16.mxu1 %v3862_v39  ;;  %v3938_v38 = vld [vmem:[#allocation6 + $0x220] ss:$8 sps:$4 sm:$0xff]  }
 0x12d   :  { %2544 = vmatprep.subr.bf16.mxu0 %v3865_v41  ;;  %v3941_v39 = vld [vmem:[#allocation6 + $0x620] ss:$8 sps:$4 sm:$0xff]   ;;  %v3949_v41 = vld [vmem:[#allocation6 + $0x634] ss:$8 sps:$4 sm:$0xff]  }
 0x12f   :  { %2381 = vmatpush1.bf16.msra.mxu1 %v3860_v40  ;;  %v3946_v40 = vld [vmem:[#allocation6 + $0x234] ss:$8 sps:$4 sm:$0xff]  }
 0x130   :  { %2545 = vmatpush1.bf16.msra.mxu0 %v3863_v42  ;;  %2382 = vmatprep.subr.bf16.mxu1 %v3868_v43  ;;  %v3944_v42 = vld [vmem:[#allocation6 + $0x230] ss:$8 sps:$4 sm:$0xff]  }
 0x131   :  { %2546 = vmatprep.subr.bf16.mxu0 %v3871_v45  ;;  %v3947_v43 = vld [vmem:[#allocation6 + $0x630] ss:$8 sps:$4 sm:$0xff]   ;;  %v3955_v45 = vld [vmem:[#allocation6 + $0x644] ss:$8 sps:$4 sm:$0xff]  }
 0x133   :  { %2383 = vmatpush1.bf16.msra.mxu1 %v3866_v44  ;;  %v3952_v44 = vld [vmem:[#allocation6 + $0x244] ss:$8 sps:$4 sm:$0xff]  }
 0x134   :  { %2547 = vmatpush1.bf16.msra.mxu0 %v3869_v46  ;;  %2384 = vmatprep.subr.bf16.mxu1 %v3874_v47  ;;  %v3950_v46 = vld [vmem:[#allocation6 + $0x240] ss:$8 sps:$4 sm:$0xff]  }
 0x135   :  { %2548 = vmatprep.subr.bf16.mxu0 %v3877_v49  ;;  %v3953_v47 = vld [vmem:[#allocation6 + $0x640] ss:$8 sps:$4 sm:$0xff]   ;;  %v3961_v49 = vld [vmem:[#allocation6 + $0x654] ss:$8 sps:$4 sm:$0xff]  }
 0x137   :  { %2385 = vmatpush1.bf16.msra.mxu1 %v3872_v48  ;;  %v3958_v48 = vld [vmem:[#allocation6 + $0x254] ss:$8 sps:$4 sm:$0xff]  }
 0x138   :  { %2549 = vmatpush1.bf16.msra.mxu0 %v3875_v50  ;;  %2386 = vmatprep.subr.bf16.mxu1 %v3880_v51  ;;  %v3956_v50 = vld [vmem:[#allocation6 + $0x250] ss:$8 sps:$4 sm:$0xff]  }
 0x139   :  { %2550 = vmatprep.subr.bf16.mxu0 %v3883_v53  ;;  %v3959_v51 = vld [vmem:[#allocation6 + $0x650] ss:$8 sps:$4 sm:$0xff]   ;;  %v3967_v53 = vld [vmem:[#allocation6 + $0x664] ss:$8 sps:$4 sm:$0xff]  }
 0x13b   :  { %2387 = vmatpush1.bf16.msra.mxu1 %v3878_v52  ;;  %v3964_v52 = vld [vmem:[#allocation6 + $0x264] ss:$8 sps:$4 sm:$0xff]  }
 0x13c   :  { %2551 = vmatpush1.bf16.msra.mxu0 %v3881_v54  ;;  %2388 = vmatprep.subr.bf16.mxu1 %v3886_v55  ;;  %v3962_v54 = vld [vmem:[#allocation6 + $0x260] ss:$8 sps:$4 sm:$0xff]  }
 0x13d   :  { %2552 = vmatprep.subr.bf16.mxu0 %v3889_v57  ;;  %v3965_v55 = vld [vmem:[#allocation6 + $0x660] ss:$8 sps:$4 sm:$0xff]   ;;  %v3973_v57 = vld [vmem:[#allocation6 + $0x674] ss:$8 sps:$4 sm:$0xff]  }
 0x13f   :  { %2389 = vmatpush1.bf16.msra.mxu1 %v3884_v56  ;;  %v3970_v56 = vld [vmem:[#allocation6 + $0x274] ss:$8 sps:$4 sm:$0xff]  }
 0x140   :  { %2553 = vmatpush1.bf16.msra.mxu0 %v3887_v58  ;;  %2390 = vmatprep.subr.bf16.mxu1 %v3892_v59  ;;  %v3968_v58 = vld [vmem:[#allocation6 + $0x270] ss:$8 sps:$4 sm:$0xff]  }
 0x141   :  { %2554 = vmatprep.subr.bf16.mxu0 %v3895_v61  ;;  %v3971_v59 = vld [vmem:[#allocation6 + $0x670] ss:$8 sps:$4 sm:$0xff]   ;;  %v3979_v61 = vld [vmem:[#allocation6 + $0x684] ss:$8 sps:$4 sm:$0xff]  }
 0x143   :  { %2391 = vmatpush1.bf16.msra.mxu1 %v3890_v60  ;;  %v3976_v60 = vld [vmem:[#allocation6 + $0x284] ss:$8 sps:$4 sm:$0xff]  }
 0x144   :  { %2555 = vmatpush1.bf16.msra.mxu0 %v3893_v62  ;;  %2392 = vmatprep.subr.bf16.mxu1 %v3898_v63  ;;  %v3974_v62 = vld [vmem:[#allocation6 + $0x280] ss:$8 sps:$4 sm:$0xff]  }
 0x145   :  { %2556 = vmatprep.subr.bf16.mxu0 %v3901_v1  ;;  %v3977_v63 = vld [vmem:[#allocation6 + $0x680] ss:$8 sps:$4 sm:$0xff]   ;;  %v3985_v1 = vld [vmem:[#allocation6 + $0x694] ss:$8 sps:$4 sm:$0xff]  }
 0x147   :  { %2393 = vmatpush1.bf16.msra.mxu1 %v3896_v0  ;;  %v3982_v0 = vld [vmem:[#allocation6 + $0x294] ss:$8 sps:$4 sm:$0xff]  }
 0x148   :  { %2557 = vmatpush1.bf16.msra.mxu0 %v3899_v3  ;;  %2394 = vmatprep.subr.bf16.mxu1 %v3904_v4  ;;  %v3980_v3 = vld [vmem:[#allocation6 + $0x290] ss:$8 sps:$4 sm:$0xff]  }
 0x149   :  { %2558 = vmatprep.subr.bf16.mxu0 %v3907_v6  ;;  %v3983_v4 = vld [vmem:[#allocation6 + $0x690] ss:$8 sps:$4 sm:$0xff]   ;;  %v3991_v6 = vld [vmem:[#allocation6 + $0x6a4] ss:$8 sps:$4 sm:$0xff]  }
 0x14b   :  { %2395 = vmatpush1.bf16.msra.mxu1 %v3902_v5  ;;  %v3988_v5 = vld [vmem:[#allocation6 + $0x2a4] ss:$8 sps:$4 sm:$0xff]  }
 0x14c   :  { %2559 = vmatpush1.bf16.msra.mxu0 %v3905_v7  ;;  %2396 = vmatprep.subr.bf16.mxu1 %v3910_v8  ;;  %v3986_v7 = vld [vmem:[#allocation6 + $0x2a0] ss:$8 sps:$4 sm:$0xff]  }
 0x14d   :  { %2560 = vmatprep.subr.bf16.mxu0 %v3913_v10  ;;  %v3989_v8 = vld [vmem:[#allocation6 + $0x6a0] ss:$8 sps:$4 sm:$0xff]   ;;  %v3997_v10 = vld [vmem:[#allocation6 + $0x6b4] ss:$8 sps:$4 sm:$0xff]  }
 0x14f   :  { %2397 = vmatpush1.bf16.msra.mxu1 %v3908_v9  ;;  %v3994_v9 = vld [vmem:[#allocation6 + $0x2b4] ss:$8 sps:$4 sm:$0xff]  }
 0x150   :  { %2561 = vmatpush1.bf16.msra.mxu0 %v3911_v11  ;;  %2398 = vmatprep.subr.bf16.mxu1 %v3916_v15  ;;  %v3992_v11 = vld [vmem:[#allocation6 + $0x2b0] ss:$8 sps:$4 sm:$0xff]  }
 0x151   :  { %2562 = vmatprep.subr.bf16.mxu0 %v3919_v17  ;;  %v3995_v15 = vld [vmem:[#allocation6 + $0x6b0] ss:$8 sps:$4 sm:$0xff]   ;;  %v4003_v17 = vld [vmem:[#allocation6 + $0x6c4] ss:$8 sps:$4 sm:$0xff]  }
 0x153   :  { %2399 = vmatpush1.bf16.msra.mxu1 %v3914_v16  ;;  %v4000_v16 = vld [vmem:[#allocation6 + $0x2c4] ss:$8 sps:$4 sm:$0xff]  }
 0x154   :  { %2563 = vmatpush1.bf16.msra.mxu0 %v3917_v18  ;;  %2400 = vmatprep.subr.bf16.mxu1 %v3922_v19  ;;  %v3998_v18 = vld [vmem:[#allocation6 + $0x2c0] ss:$8 sps:$4 sm:$0xff]  }
 0x155   :  { %2564 = vmatprep.subr.bf16.mxu0 %v3925_v20  ;;  %v4001_v19 = vld [vmem:[#allocation6 + $0x6c0] ss:$8 sps:$4 sm:$0xff]   ;;  %v4006_v20 = vld [vmem:[#allocation6 + $0x2d4] ss:$8 sps:$4 sm:$0xff]  }
 0x157   :  { %2401 = vmatpush1.bf16.msra.mxu1 %v3920_v22  ;;  %v4009_v22 = vld [vmem:[#allocation6 + $0x6d4] ss:$8 sps:$4 sm:$0xff]  }
 0x158   :  { %2565 = vmatpush1.bf16.msra.mxu0 %v3923_v2  ;;  %2411 = vmatprep.subr.bf16.mxu1 %v3928_v25  ;;  %v4004_v2 = vld [vmem:[#allocation6 + $0x2d0] ss:$8 sps:$4 sm:$0xff]  }
 0x159   :  { %2575 = vmatprep.subr.bf16.mxu0 %v3931_v30  ;;  %v4007_v25 = vld [vmem:[#allocation6 + $0x6d0] ss:$8 sps:$4 sm:$0xff]   ;;  %v4690_v30 = vpop.permute.xlu0 %264 }
 0x15a   :  { %3566 = vmatmul.mubr.msk.bf16.vlgmr.msra.gmra.mrb[0].mxu1 %vm4676_vm14, %v4476_v21  ;;  %vm267_vm9 = vcmp.eq.s32.totalorder %v4690_v30, %v4647_v14  ;;  %vm266_vm13 = vcmp.eq.s32.totalorder %v4690_v30, %v4644_v13  ;;  %v4126_v30 = vld [vmem:[#allocation6 + $0x824] ss:$8 sps:$4 sm:$0xff]  }
 0x15b   :  { %3582 = vmatmul.mubr.msk.bf16.vlgmr.msra.gmra.mrb[0].mxu0 %vm3581_vm1, %v4476_v21  ;;  %2412 = vmatpush1.bf16.msra.mxu1 %v3926_v28  ;;  %v4015_v28 = vld [vmem:[#allocation6 + $0x6e4] ss:$8 sps:$4 sm:$0xff]   ;;  %vm3587_vm11 = vmpackc.low %vm267_vm9, %vm267_vm9  ;;  %vm3056_vm9 = vcmask 261120  }
 0x15c   :  { %2576 = vmatpush1.bf16.msra.mxu0 %v3929_v29  ;;  %2413 = vmatprep.subr.bf16.mxu1 %v3934_v32  ;;  %v4013_v29 = vld [vmem:[#allocation6 + $0x6e0] ss:$8 sps:$4 sm:$0xff]   ;;  %v4018_v32 = vld [vmem:[#allocation6 + $0x2f4] ss:$8 sps:$4 sm:$0xff]   ;;  %vm3589_vm0 = vmpackc.low %vm266_vm13, %vm266_vm13 }
 0x15d   :  { %2577 = vmatprep.subr.bf16.mxu0 %v3937_v34  ;;  %3584 = vmatprep.mubr.msk.bf16.mxu0 %vm3583_vm2, %v4476_v21  ;;  %v4019_v34 = vld [vmem:[#allocation6 + $0x6f0] ss:$8 sps:$4 sm:$0xff]  }
 0x15e   :  { %3568 = vmatprep.mubr.msk.bf16.mxu1 %vm3567_vm3, %v4476_v21 }
 0x15f   :  { %2414 = vmatpush1.bf16.msra.mxu1 %v3932_v24  ;;  %v4016_v24 = vld [vmem:[#allocation6 + $0x2f0] ss:$8 sps:$4 sm:$0xff]  }
 0x160   :  { %2578 = vmatpush1.bf16.msra.mxu0 %v3935_v35  ;;  %2415 = vmatprep.subr.bf16.mxu1 %v3940_v36  ;;  %v4024_v35 = vld [vmem:[#allocation6 + $0x304] ss:$8 sps:$4 sm:$0xff]   ;;  %v4694_v36 = vpop.permute.xlu0 %192 }
 0x161   :  { %2579 = vmatprep.subr.bf16.mxu0 %v3943_v37  ;;  %v4027_v37 = vld [vmem:[#allocation6 + $0x704] ss:$8 sps:$4 sm:$0xff]   ;;  %vm195_vm7 = vcmp.eq.s32.totalorder %v4694_v36, %v4647_v14  ;;  %vm194_vm12 = vcmp.eq.s32.totalorder %v4694_v36, %v4644_v13  ;;  %v4121_v36 = vld [vmem:[#allocation6 + $0x810] ss:$8 sps:$4 sm:$0xff]  }
 0x162   :  { %vm3571_vm10 = vmpackc.low %vm195_vm7, %vm195_vm7 }
 0x163   :  { %2416 = vmatpush1.bf16.msra.mxu1 %v3938_v38  ;;  %v4022_v38 = vld [vmem:[#allocation6 + $0x300] ss:$8 sps:$4 sm:$0xff]   ;;  %vm3573_vm15 = vmpackc.low %vm194_vm12, %vm194_vm12 }
 0x164   :  { %2580 = vmatpush1.bf16.msra.mxu0 %v3941_v39  ;;  %2417 = vmatprep.subr.bf16.mxu1 %v3946_v40  ;;  %v4025_v39 = vld [vmem:[#allocation6 + $0x700] ss:$8 sps:$4 sm:$0xff]   ;;  %v4030_v40 = vld [vmem:[#allocation6 + $0x314] ss:$8 sps:$4 sm:$0xff]  }
 0x165   :  { %2581 = vmatprep.subr.bf16.mxu0 %v3949_v41  ;;  %v4031_v41 = vld [vmem:[#allocation6 + $0x710] ss:$8 sps:$4 sm:$0xff]  }
 0x167   :  { %2418 = vmatpush1.bf16.msra.mxu1 %v3944_v42  ;;  %v4036_v42 = vld [vmem:[#allocation6 + $0x324] ss:$8 sps:$4 sm:$0xff]  }
 0x168   :  { %2582 = vmatpush1.bf16.msra.mxu0 %v3947_v43  ;;  %2419 = vmatprep.subr.bf16.mxu1 %v3952_v44  ;;  %v4039_v43 = vld [vmem:[#allocation6 + $0x724] ss:$8 sps:$4 sm:$0xff]   ;;  %v4034_v44 = vld [vmem:[#allocation6 + $0x320] ss:$8 sps:$4 sm:$0xff]  }
 0x169   :  { %2583 = vmatprep.subr.bf16.mxu0 %v3955_v45  ;;  %v4037_v45 = vld [vmem:[#allocation6 + $0x720] ss:$8 sps:$4 sm:$0xff]  }
 0x16b   :  { %2420 = vmatpush1.bf16.msra.mxu1 %v3950_v46  ;;  %v4042_v46 = vld [vmem:[#allocation6 + $0x334] ss:$8 sps:$4 sm:$0xff]  }
 0x16c   :  { %2584 = vmatpush1.bf16.msra.mxu0 %v3953_v47  ;;  %2421 = vmatprep.subr.bf16.mxu1 %v3958_v48  ;;  %v4045_v47 = vld [vmem:[#allocation6 + $0x734] ss:$8 sps:$4 sm:$0xff]   ;;  %v4040_v48 = vld [vmem:[#allocation6 + $0x330] ss:$8 sps:$4 sm:$0xff]  }
 0x16d   :  { %2585 = vmatprep.subr.bf16.mxu0 %v3961_v49  ;;  %v4043_v49 = vld [vmem:[#allocation6 + $0x730] ss:$8 sps:$4 sm:$0xff]  }
 0x16f   :  { %2422 = vmatpush1.bf16.msra.mxu1 %v3956_v50  ;;  %v4048_v50 = vld [vmem:[#allocation6 + $0x344] ss:$8 sps:$4 sm:$0xff]  }
 0x170   :  { %2586 = vmatpush1.bf16.msra.mxu0 %v3959_v51  ;;  %2423 = vmatprep.subr.bf16.mxu1 %v3964_v52  ;;  %v4051_v51 = vld [vmem:[#allocation6 + $0x744] ss:$8 sps:$4 sm:$0xff]   ;;  %v4046_v52 = vld [vmem:[#allocation6 + $0x340] ss:$8 sps:$4 sm:$0xff]  }
 0x171   :  { %2587 = vmatprep.subr.bf16.mxu0 %v3967_v53  ;;  %v4049_v53 = vld [vmem:[#allocation6 + $0x740] ss:$8 sps:$4 sm:$0xff]  }
 0x173   :  { %2424 = vmatpush1.bf16.msra.mxu1 %v3962_v54  ;;  %v4054_v54 = vld [vmem:[#allocation6 + $0x354] ss:$8 sps:$4 sm:$0xff]  }
 0x174   :  { %2588 = vmatpush1.bf16.msra.mxu0 %v3965_v55  ;;  %2425 = vmatprep.subr.bf16.mxu1 %v3970_v56  ;;  %v4057_v55 = vld [vmem:[#allocation6 + $0x754] ss:$8 sps:$4 sm:$0xff]   ;;  %v4052_v56 = vld [vmem:[#allocation6 + $0x350] ss:$8 sps:$4 sm:$0xff]  }
 0x175   :  { %2589 = vmatprep.subr.bf16.mxu0 %v3973_v57  ;;  %v4055_v57 = vld [vmem:[#allocation6 + $0x750] ss:$8 sps:$4 sm:$0xff]  }
 0x177   :  { %2426 = vmatpush1.bf16.msra.mxu1 %v3968_v58  ;;  %v4060_v58 = vld [vmem:[#allocation6 + $0x364] ss:$8 sps:$4 sm:$0xff]  }
 0x178   :  { %2590 = vmatpush1.bf16.msra.mxu0 %v3971_v59  ;;  %2427 = vmatprep.subr.bf16.mxu1 %v3976_v60  ;;  %v4063_v59 = vld [vmem:[#allocation6 + $0x764] ss:$8 sps:$4 sm:$0xff]   ;;  %v4058_v60 = vld [vmem:[#allocation6 + $0x360] ss:$8 sps:$4 sm:$0xff]  }
 0x179   :  { %2591 = vmatprep.subr.bf16.mxu0 %v3979_v61  ;;  %v4061_v61 = vld [vmem:[#allocation6 + $0x760] ss:$8 sps:$4 sm:$0xff]  }
 0x17b   :  { %2428 = vmatpush1.bf16.msra.mxu1 %v3974_v62  ;;  %v4066_v62 = vld [vmem:[#allocation6 + $0x374] ss:$8 sps:$4 sm:$0xff]  }
 0x17c   :  { %2592 = vmatpush1.bf16.msra.mxu0 %v3977_v63  ;;  %2429 = vmatprep.subr.bf16.mxu1 %v3982_v0  ;;  %v4069_v63 = vld [vmem:[#allocation6 + $0x774] ss:$8 sps:$4 sm:$0xff]   ;;  %v4064_v0 = vld [vmem:[#allocation6 + $0x370] ss:$8 sps:$4 sm:$0xff]  }
 0x17d   :  { %2593 = vmatprep.subr.bf16.mxu0 %v3985_v1  ;;  %v4067_v1 = vld [vmem:[#allocation6 + $0x770] ss:$8 sps:$4 sm:$0xff]  }
 0x17f   :  { %2430 = vmatpush1.bf16.msra.mxu1 %v3980_v3  ;;  %v4072_v3 = vld [vmem:[#allocation6 + $0x384] ss:$8 sps:$4 sm:$0xff]  }
 0x180   :  { %2594 = vmatpush1.bf16.msra.mxu0 %v3983_v4  ;;  %2431 = vmatprep.subr.bf16.mxu1 %v3988_v5  ;;  %v4075_v4 = vld [vmem:[#allocation6 + $0x784] ss:$8 sps:$4 sm:$0xff]   ;;  %v4070_v5 = vld [vmem:[#allocation6 + $0x380] ss:$8 sps:$4 sm:$0xff]  }
 0x181   :  { %2595 = vmatprep.subr.bf16.mxu0 %v3991_v6  ;;  %v4073_v6 = vld [vmem:[#allocation6 + $0x780] ss:$8 sps:$4 sm:$0xff]  }
 0x183   :  { %2432 = vmatpush1.bf16.msra.mxu1 %v3986_v7  ;;  %v4078_v7 = vld [vmem:[#allocation6 + $0x394] ss:$8 sps:$4 sm:$0xff]  }
 0x184   :  { %2596 = vmatpush1.bf16.msra.mxu0 %v3989_v8  ;;  %2433 = vmatprep.subr.bf16.mxu1 %v3994_v9  ;;  %v4081_v8 = vld [vmem:[#allocation6 + $0x794] ss:$8 sps:$4 sm:$0xff]   ;;  %v4076_v9 = vld [vmem:[#allocation6 + $0x390] ss:$8 sps:$4 sm:$0xff]  }
 0x185   :  { %2597 = vmatprep.subr.bf16.mxu0 %v3997_v10  ;;  %v4079_v10 = vld [vmem:[#allocation6 + $0x790] ss:$8 sps:$4 sm:$0xff]  }
 0x187   :  { %2434 = vmatpush1.bf16.msra.mxu1 %v3992_v11  ;;  %v4084_v11 = vld [vmem:[#allocation6 + $0x3a4] ss:$8 sps:$4 sm:$0xff]  }
 0x188   :  { %2598 = vmatpush1.bf16.msra.mxu0 %v3995_v15  ;;  %2435 = vmatprep.subr.bf16.mxu1 %v4000_v16  ;;  %v4087_v15 = vld [vmem:[#allocation6 + $0x7a4] ss:$8 sps:$4 sm:$0xff]   ;;  %v4082_v16 = vld [vmem:[#allocation6 + $0x3a0] ss:$8 sps:$4 sm:$0xff]  }
 0x189   :  { %2599 = vmatprep.subr.bf16.mxu0 %v4003_v17  ;;  %v4085_v17 = vld [vmem:[#allocation6 + $0x7a0] ss:$8 sps:$4 sm:$0xff]  }
 0x18b   :  { %2436 = vmatpush1.bf16.msra.mxu1 %v3998_v18  ;;  %v4090_v18 = vld [vmem:[#allocation6 + $0x3b4] ss:$8 sps:$4 sm:$0xff]  }
 0x18c   :  { %2600 = vmatpush1.bf16.msra.mxu0 %v4001_v19  ;;  %2437 = vmatprep.subr.bf16.mxu1 %v4006_v20  ;;  %v4093_v19 = vld [vmem:[#allocation6 + $0x7b4] ss:$8 sps:$4 sm:$0xff]   ;;  %v4088_v20 = vld [vmem:[#allocation6 + $0x3b0] ss:$8 sps:$4 sm:$0xff]  }
 0x18d   :  { %2601 = vmatprep.subr.bf16.mxu0 %v4009_v22  ;;  %v4091_v22 = vld [vmem:[#allocation6 + $0x7b0] ss:$8 sps:$4 sm:$0xff]  }
 0x18f   :  { %2438 = vmatpush1.bf16.msra.mxu1 %v4004_v2  ;;  %v4096_v2 = vld [vmem:[#allocation6 + $0x3c4] ss:$8 sps:$4 sm:$0xff]  }
 0x190   :  { %2602 = vmatpush1.bf16.msra.mxu0 %v4007_v25  ;;  %2439 = vmatprep.subr.bf16.mxu1 %v4012_v27  ;;  %v4099_v25 = vld [vmem:[#allocation6 + $0x7c4] ss:$8 sps:$4 sm:$0xff]   ;;  %v4094_v27 = vld [vmem:[#allocation6 + $0x3c0] ss:$8 sps:$4 sm:$0xff]  }
 0x191   :  { %2603 = vmatprep.subr.bf16.mxu0 %v4015_v28  ;;  %v4097_v28 = vld [vmem:[#allocation6 + $0x7c0] ss:$8 sps:$4 sm:$0xff]  }
 0x193   :  { %2440 = vmatpush1.bf16.msra.mxu1 %v4010_v31  ;;  %v4102_v31 = vld [vmem:[#allocation6 + $0x3d4] ss:$8 sps:$4 sm:$0xff]  }
 0x194   :  { %2604 = vmatpush1.bf16.msra.mxu0 %v4013_v29  ;;  %2441 = vmatprep.subr.bf16.mxu1 %v4018_v32  ;;  %v4105_v29 = vld [vmem:[#allocation6 + $0x7d4] ss:$8 sps:$4 sm:$0xff]   ;;  %v4100_v32 = vld [vmem:[#allocation6 + $0x3d0] ss:$8 sps:$4 sm:$0xff]  }
 0x195   :  { %2605 = vmatprep.subr.bf16.mxu0 %v4021_v33  ;;  %v4103_v33 = vld [vmem:[#allocation6 + $0x7d0] ss:$8 sps:$4 sm:$0xff]  }
 0x197   :  { %2442 = vmatpush1.bf16.msra.mxu1 %v4016_v24  ;;  %v4108_v24 = vld [vmem:[#allocation6 + $0x3e4] ss:$8 sps:$4 sm:$0xff]  }
 0x198   :  { %2606 = vmatpush1.bf16.msra.mxu0 %v4019_v34  ;;  %2452 = vmatprep.subr.bf16.mxu1 %v4024_v35  ;;  %v4111_v34 = vld [vmem:[#allocation6 + $0x7e4] ss:$8 sps:$4 sm:$0xff]   ;;  %v4106_v35 = vld [vmem:[#allocation6 + $0x3e0] ss:$8 sps:$4 sm:$0xff]  }
 0x199   :  { %2616 = vmatprep.subr.bf16.mxu0 %v4027_v37  ;;  %v4109_v37 = vld [vmem:[#allocation6 + $0x7e0] ss:$8 sps:$4 sm:$0xff]  }
 0x19a   :  { %3570 = vmatmul.mubr.msk.bf16.vlgmr.msra.gmra.mrb[0].mxu1 %vm3569_vm6, %v4476_v21 }
 0x19b   :  { %3586 = vmatmul.mubr.msk.bf16.vlgmr.msra.gmra.mrb[0].mxu0 %vm3585_vm8, %v4476_v21  ;;  %2453 = vmatpush1.bf16.msra.mxu1 %v4022_v38  ;;  %v4114_v38 = vld [vmem:[#allocation6 + $0x3f4] ss:$8 sps:$4 sm:$0xff]   ;;  %vm4479_vm8 = vmmov 0  }
 0x19c   :  { %2617 = vmatpush1.bf16.msra.mxu0 %v4025_v39  ;;  %2454 = vmatprep.subr.bf16.mxu1 %v4030_v40  ;;  %v4117_v39 = vld [vmem:[#allocation6 + $0x7f4] ss:$8 sps:$4 sm:$0xff]   ;;  %v4112_v40 = vld [vmem:[#allocation6 + $0x3f0] ss:$8 sps:$4 sm:$0xff]  }
 0x19d   :  { %2618 = vmatprep.subr.bf16.mxu0 %v4033_v26  ;;  %3572 = vmatprep.mubr.msk.bf16.mxu1 %vm3571_vm10, %v4476_v21  ;;  %v4706_v26 = vpop.permute.xlu1 %282 }
 0x19e   :  { %3588 = vmatprep.mubr.msk.bf16.mxu0 %vm3587_vm11, %v4476_v21  ;;  %vm285_vm14 = vcmp.eq.s32.totalorder %v4706_v26, %v4647_v14  ;;  %vm284_vm2 = vcmp.eq.s32.totalorder %v4706_v26, %v4644_v13  ;;  %v4221_v26 = vld [vmem:[#allocation9 + $0x18] sm:$0xff]  }
 0x19f   :  { %2455 = vmatpush1.bf16.msra.mxu1 %v4028_v23  ;;  %v4115_v23 = vld [vmem:[#allocation6 + $0x7f0] ss:$8 sps:$4 sm:$0xff]   ;;  %vm3591_vm1 = vmpackc.low %vm285_vm14, %vm285_vm14 }
 0x1a0   :  { %2619 = vmatpush1.bf16.msra.mxu0 %v4031_v41  ;;  %2456 = vmatprep.subr.bf16.mxu1 %v4036_v42  ;;  %v4120_v41 = vld [vmem:[#allocation6 + $0x804] ss:$8 sps:$4 sm:$0xff]   ;;  %v4118_v42 = vld [vmem:[#allocation6 + $0x800] ss:$8 sps:$4 sm:$0xff]   ;;  %vm3593_vm4 = vmpackc.low %vm284_vm2, %vm284_vm2 }
 0x1a1   :  { %2620 = vmatprep.subr.bf16.mxu0 %v4039_v43  ;;  %v4123_v43 = vld [vmem:[#allocation6 + $0x814] ss:$8 sps:$4 sm:$0xff]  }
 0x1a3   :  { %2457 = vmatpush1.bf16.msra.mxu1 %v4034_v44  ;;  %v4124_v44 = vld [vmem:[#allocation6 + $0x820] ss:$8 sps:$4 sm:$0xff]  }
 0x1a4   :  { %2621 = vmatpush1.bf16.msra.mxu0 %v4037_v45  ;;  %2458 = vmatprep.subr.bf16.mxu1 %v4042_v46  ;;  %v4129_v45 = vld [vmem:[#allocation6 + $0x834] ss:$8 sps:$4 sm:$0xff]   ;;  %v4127_v46 = vld [vmem:[#allocation6 + $0x830] ss:$8 sps:$4 sm:$0xff]  }
 0x1a5   :  { %2622 = vmatprep.subr.bf16.mxu0 %v4045_v47  ;;  %v4132_v47 = vld [vmem:[#allocation6 + $0x844] ss:$8 sps:$4 sm:$0xff]  }
 0x1a7   :  { %2459 = vmatpush1.bf16.msra.mxu1 %v4040_v48  ;;  %v4130_v48 = vld [vmem:[#allocation6 + $0x840] ss:$8 sps:$4 sm:$0xff]  }
 0x1a8   :  { %2623 = vmatpush1.bf16.msra.mxu0 %v4043_v49  ;;  %2460 = vmatprep.subr.bf16.mxu1 %v4048_v50  ;;  %v4135_v49 = vld [vmem:[#allocation6 + $0x854] ss:$8 sps:$4 sm:$0xff]   ;;  %v4133_v50 = vld [vmem:[#allocation6 + $0x850] ss:$8 sps:$4 sm:$0xff]  }
 0x1a9   :  { %2624 = vmatprep.subr.bf16.mxu0 %v4051_v51  ;;  %v4138_v51 = vld [vmem:[#allocation6 + $0x864] ss:$8 sps:$4 sm:$0xff]  }
 0x1ab   :  { %2461 = vmatpush1.bf16.msra.mxu1 %v4046_v52  ;;  %v4136_v52 = vld [vmem:[#allocation6 + $0x860] ss:$8 sps:$4 sm:$0xff]  }
 0x1ac   :  { %2625 = vmatpush1.bf16.msra.mxu0 %v4049_v53  ;;  %2462 = vmatprep.subr.bf16.mxu1 %v4054_v54  ;;  %v4141_v53 = vld [vmem:[#allocation6 + $0x874] ss:$8 sps:$4 sm:$0xff]   ;;  %v4139_v54 = vld [vmem:[#allocation6 + $0x870] ss:$8 sps:$4 sm:$0xff]  }
 0x1ad   :  { %2626 = vmatprep.subr.bf16.mxu0 %v4057_v55  ;;  %v4144_v55 = vld [vmem:[#allocation6 + $0x884] ss:$8 sps:$4 sm:$0xff]  }
 0x1af   :  { %2463 = vmatpush1.bf16.msra.mxu1 %v4052_v56  ;;  %v4142_v56 = vld [vmem:[#allocation6 + $0x880] ss:$8 sps:$4 sm:$0xff]  }
 0x1b0   :  { %2627 = vmatpush1.bf16.msra.mxu0 %v4055_v57  ;;  %2464 = vmatprep.subr.bf16.mxu1 %v4060_v58  ;;  %v4147_v57 = vld [vmem:[#allocation6 + $0x894] ss:$8 sps:$4 sm:$0xff]   ;;  %v4145_v58 = vld [vmem:[#allocation6 + $0x890] ss:$8 sps:$4 sm:$0xff]  }
 0x1b1   :  { %2628 = vmatprep.subr.bf16.mxu0 %v4063_v59  ;;  %v4150_v59 = vld [vmem:[#allocation6 + $0x8a4] ss:$8 sps:$4 sm:$0xff]  }
 0x1b3   :  { %2465 = vmatpush1.bf16.msra.mxu1 %v4058_v60  ;;  %v4148_v60 = vld [vmem:[#allocation6 + $0x8a0] ss:$8 sps:$4 sm:$0xff]  }
 0x1b4   :  { %2629 = vmatpush1.bf16.msra.mxu0 %v4061_v61  ;;  %2466 = vmatprep.subr.bf16.mxu1 %v4066_v62  ;;  %v4153_v61 = vld [vmem:[#allocation6 + $0x8b4] ss:$8 sps:$4 sm:$0xff]   ;;  %v4151_v62 = vld [vmem:[#allocation6 + $0x8b0] ss:$8 sps:$4 sm:$0xff]  }
 0x1b5   :  { %2630 = vmatprep.subr.bf16.mxu0 %v4069_v63  ;;  %v4156_v63 = vld [vmem:[#allocation6 + $0x8c4] ss:$8 sps:$4 sm:$0xff]  }
 0x1b7   :  { %2467 = vmatpush1.bf16.msra.mxu1 %v4064_v0  ;;  %v4154_v0 = vld [vmem:[#allocation6 + $0x8c0] ss:$8 sps:$4 sm:$0xff]  }
 0x1b8   :  { %2631 = vmatpush1.bf16.msra.mxu0 %v4067_v1  ;;  %2468 = vmatprep.subr.bf16.mxu1 %v4072_v3  ;;  %v4159_v1 = vld [vmem:[#allocation6 + $0x8d4] ss:$8 sps:$4 sm:$0xff]   ;;  %v4157_v3 = vld [vmem:[#allocation6 + $0x8d0] ss:$8 sps:$4 sm:$0xff]  }
 0x1b9   :  { %2632 = vmatprep.subr.bf16.mxu0 %v4075_v4  ;;  %v4162_v4 = vld [vmem:[#allocation6 + $0x8e4] ss:$8 sps:$4 sm:$0xff]  }
 0x1bb   :  { %2469 = vmatpush1.bf16.msra.mxu1 %v4070_v5  ;;  %v4160_v5 = vld [vmem:[#allocation6 + $0x8e0] ss:$8 sps:$4 sm:$0xff]  }
 0x1bc   :  { %2633 = vmatpush1.bf16.msra.mxu0 %v4073_v6  ;;  %2470 = vmatprep.subr.bf16.mxu1 %v4078_v7  ;;  %v4165_v6 = vld [vmem:[#allocation6 + $0x8f4] ss:$8 sps:$4 sm:$0xff]   ;;  %v4717_v7 = vpop.permute.xlu1 %300 }
 0x1bd   :  { %2634 = vmatprep.subr.bf16.mxu0 %v4081_v8  ;;  %v4163_v8 = vld [vmem:[#allocation6 + $0x8f0] ss:$8 sps:$4 sm:$0xff]   ;;  %vm303_vm3 = vcmp.eq.s32.totalorder %v4717_v7, %v4647_v14  ;;  %vm302_vm6 = vcmp.eq.s32.totalorder %v4717_v7, %v4644_v13  ;;  %v650_v13 = vshrl.u32 %v134_v12, 7 }
 0x1be   :  { %vm3595_vm5 = vmpackc.low %vm303_vm3, %vm303_vm3  ;;  %v4175_v14 = vld [vmem:[#allocation6 + $0x930] ss:$8 sps:$4 sm:$0xff]  }
 0x1bf   :  { %2471 = vmatpush1.bf16.msra.mxu1 %v4076_v9  ;;  %v4168_v9 = vld [vmem:[#allocation6 + $0x904] ss:$8 sps:$4 sm:$0xff]   ;;  %vm3597_vm7 = vmpackc.low %vm302_vm6, %vm302_vm6  ;;  %v4230_v12 = vld [vmem:[%s4770_s5] sm:$0xff]  }
 0x1c0   :  { %2635 = vmatpush1.bf16.msra.mxu0 %v4079_v10  ;;  %2472 = vmatprep.subr.bf16.mxu1 %v4084_v11  ;;  %v4166_v10 = vld [vmem:[#allocation6 + $0x900] ss:$8 sps:$4 sm:$0xff]   ;;  %v4171_v11 = vld [vmem:[#allocation6 + $0x914] ss:$8 sps:$4 sm:$0xff]  }
 0x1c1   :  { %2636 = vmatprep.subr.bf16.mxu0 %v4087_v15  ;;  %v4169_v15 = vld [vmem:[#allocation6 + $0x910] ss:$8 sps:$4 sm:$0xff]  }
 0x1c3   :  { %2473 = vmatpush1.bf16.msra.mxu1 %v4082_v16  ;;  %v4174_v16 = vld [vmem:[#allocation6 + $0x924] ss:$8 sps:$4 sm:$0xff]  }
 0x1c4   :  { %2637 = vmatpush1.bf16.msra.mxu0 %v4085_v17  ;;  %2474 = vmatprep.subr.bf16.mxu1 %v4090_v18  ;;  %v4172_v17 = vld [vmem:[#allocation6 + $0x920] ss:$8 sps:$4 sm:$0xff]   ;;  %v4177_v18 = vld [vmem:[#allocation6 + $0x934] ss:$8 sps:$4 sm:$0xff]  }
 0x1c5   :  { %2638 = vmatprep.subr.bf16.mxu0 %v4093_v19  ;;  %v4180_v19 = vld [vmem:[#allocation6 + $0x944] ss:$8 sps:$4 sm:$0xff]  }
 0x1c7   :  { %2475 = vmatpush1.bf16.msra.mxu1 %v4088_v20  ;;  %v4178_v20 = vld [vmem:[#allocation6 + $0x940] ss:$8 sps:$4 sm:$0xff]  }
 0x1c8   :  { %2639 = vmatpush1.bf16.msra.mxu0 %v4091_v22  ;;  %2476 = vmatprep.subr.bf16.mxu1 %v4096_v2  ;;  %v4183_v22 = vld [vmem:[#allocation6 + $0x954] ss:$8 sps:$4 sm:$0xff]   ;;  %v4181_v2 = vld [vmem:[#allocation6 + $0x950] ss:$8 sps:$4 sm:$0xff]  }
 0x1c9   :  { %2640 = vmatprep.subr.bf16.mxu0 %v4099_v25  ;;  %v4186_v25 = vld [vmem:[#allocation6 + $0x964] ss:$8 sps:$4 sm:$0xff]  }
 0x1cb   :  { %2477 = vmatpush1.bf16.msra.mxu1 %v4094_v27  ;;  %v4184_v27 = vld [vmem:[#allocation6 + $0x960] ss:$8 sps:$4 sm:$0xff]  }
 0x1cc   :  { %2641 = vmatpush1.bf16.msra.mxu0 %v4097_v28  ;;  %2478 = vmatprep.subr.bf16.mxu1 %v4102_v31  ;;  %v4214_v28 = vld [vmem:[#allocation9 + $0x40] sm:$0xff]  }
 0x1cd   :  { %2642 = vmatprep.subr.bf16.mxu0 %v4105_v29  ;;  %v4215_v31 = vld [vmem:[#allocation9] sm:$0xff]   ;;  %v4216_v29 = vld [vmem:[#allocation9 + $0x48] sm:$0xff]  }
 0x1cf   :  { %2479 = vmatpush1.bf16.msra.mxu1 %v4100_v32  ;;  %v4189_v32 = vld [vmem:[#allocation6 + $0x974] ss:$8 sps:$4 sm:$0xff]  }
 0x1d0   :  { %2643 = vmatpush1.bf16.msra.mxu0 %v4103_v33  ;;  %2480 = vmatprep.subr.bf16.mxu1 %v4108_v24  ;;  %v4217_v33 = vld [vmem:[#allocation9 + $0x8] sm:$0xff]  }
 0x1d1   :  { %2644 = vmatprep.subr.bf16.mxu0 %v4111_v34  ;;  %v4187_v24 = vld [vmem:[#allocation6 + $0x970] ss:$8 sps:$4 sm:$0xff]  }
 0x1d2   :  { %v4218_v34 = vld [vmem:[#allocation9 + $0x50] sm:$0xff]  }
 0x1d3   :  { %2481 = vmatpush1.bf16.msra.mxu1 %v4106_v35  ;;  %v4192_v35 = vld [vmem:[#allocation6 + $0x984] ss:$8 sps:$4 sm:$0xff]  }
 0x1d4   :  { %2645 = vmatpush1.bf16.msra.mxu0 %v4109_v37  ;;  %2482 = vmatprep.subr.bf16.mxu1 %v4114_v38  ;;  %v4219_v37 = vld [vmem:[#allocation9 + $0x10] sm:$0xff]   ;;  %v4190_v38 = vld [vmem:[#allocation6 + $0x980] ss:$8 sps:$4 sm:$0xff]  }
 0x1d5   :  { %2646 = vmatprep.subr.bf16.mxu0 %v4117_v39  ;;  %v4220_v39 = vld [vmem:[#allocation9 + $0x58] sm:$0xff]  }
 0x1d7   :  { %2483 = vmatpush1.bf16.msra.mxu1 %v4112_v40  ;;  %v4195_v40 = vld [vmem:[#allocation6 + $0x994] ss:$8 sps:$4 sm:$0xff]  }
 0x1d8   :  { %2647 = vmatpush1.bf16.msra.mxu0 %v4115_v23  ;;  %3599 = vmatprep.subr.bf16.mxu1 %v4214_v28  ;;  %v4193_v23 = vld [vmem:[#allocation6 + $0x990] ss:$8 sps:$4 sm:$0xff]  }
 0x1d9   :  { %2657 = vmatprep.subr.bf16.mxu0 %v4120_v41  ;;  %v4222_v41 = vld [vmem:[#allocation9 + $0x60] sm:$0xff]   ;;  %v4237_v28 = vld [vmem:[%s4770_s5 + $0x38] sm:$0xff]  }
 0x1da   :  { %3574 = vmatmul.mubr.msk.bf16.vlgmr.msra.gmra.mrb[0].mxu1 %vm3573_vm15, %v4476_v21 }
 0x1db   :  { %3590 = vmatmul.mubr.msk.bf16.vlgmr.msra.gmra.mrb[0].mxu0 %vm3589_vm0, %v4476_v21  ;;  %3600 = vmatpush3.bf16.msra.mxu1 %v4215_v31 }
 0x1dc   :  { %2658 = vmatpush1.bf16.msra.mxu0 %v4118_v42  ;;  %3592 = vmatprep.mubr.msk.bf16.mxu0 %vm3591_vm1, %v4476_v21  ;;  %v4198_v42 = vld [vmem:[#allocation6 + $0x9a4] ss:$8 sps:$4 sm:$0xff]  }
 0x1dd   :  { %2659 = vmatprep.subr.bf16.mxu0 %v4123_v43  ;;  %3601 = vmatprep.subr.bf16.mxu1 %v4216_v29  ;;  %v4223_v43 = vld [vmem:[#allocation9 + $0x20] sm:$0xff]  }
 0x1de   :  { %v3499_v29 = vld [vmem:[#allocation11] ss:$0 sm:$0xff] }
 0x1df   :  { %3602 = vmatpush3.bf16.msra.mxu1 %v4217_v33 }
 0x1e0   :  { %2660 = vmatpush1.bf16.msra.mxu0 %v4121_v36  ;;  %3603 = vmatprep.subr.bf16.mxu1 %v4218_v34  ;;  %v4196_v36 = vld [vmem:[#allocation6 + $0x9a0] ss:$8 sps:$4 sm:$0xff]  }
 0x1e1   :  { %2661 = vmatprep.subr.bf16.mxu0 %v4126_v30  ;;  %v4224_v30 = vld [vmem:[#allocation9 + $0x68] sm:$0xff]  }
 0x1e3   :  { %3604 = vmatpush3.bf16.msra.mxu1 %v4219_v37 }
 0x1e4   :  { %2662 = vmatpush1.bf16.msra.mxu0 %v4124_v44  ;;  %3605 = vmatprep.subr.bf16.mxu1 %v4220_v39  ;;  %v4201_v44 = vld [vmem:[#allocation6 + $0x9b4] ss:$8 sps:$4 sm:$0xff]  }
 0x1e5   :  { %2663 = vmatprep.subr.bf16.mxu0 %v4129_v45  ;;  %v4225_v45 = vld [vmem:[#allocation9 + $0x28] sm:$0xff]  }
 0x1e7   :  { %3606 = vmatpush3.bf16.msra.mxu1 %v4221_v26  ;;  %v3516_v26 = vld [vmem:[#allocation12] ss:$0 sm:$0xff] }
 0x1e8   :  { %2664 = vmatpush1.bf16.msra.mxu0 %v4127_v46  ;;  %3607 = vmatprep.subr.bf16.mxu1 %v4222_v41  ;;  %v4199_v46 = vld [vmem:[#allocation6 + $0x9b0] ss:$8 sps:$4 sm:$0xff]  }
 0x1e9   :  { %2665 = vmatprep.subr.bf16.mxu0 %v4132_v47  ;;  %v4204_v47 = vld [vmem:[#allocation6 + $0x9c4] ss:$8 sps:$4 sm:$0xff]  }
 0x1eb   :  { %3608 = vmatpush3.bf16.msra.mxu1 %v4223_v43 }
 0x1ec   :  { %2666 = vmatpush1.bf16.msra.mxu0 %v4130_v48  ;;  %3609 = vmatprep.subr.bf16.mxu1 %v4224_v30  ;;  %v4202_v48 = vld [vmem:[#allocation6 + $0x9c0] ss:$8 sps:$4 sm:$0xff]  }
 0x1ed   :  { %2667 = vmatprep.subr.bf16.mxu0 %v4135_v49  ;;  %v4207_v49 = vld [vmem:[#allocation6 + $0x9d4] ss:$8 sps:$4 sm:$0xff]  }
 0x1ef   :  { %3610 = vmatpush3.bf16.msra.mxu1 %v4225_v45  ;;  %v3525_v45 = vld [vmem:[#allocation15] ss:$0 sm:$0xff] }
 0x1f0   :  { %2668 = vmatpush1.bf16.msra.mxu0 %v4133_v50  ;;  %v4205_v50 = vld [vmem:[#allocation6 + $0x9d0] ss:$8 sps:$4 sm:$0xff]  }
 0x1f1   :  { %2669 = vmatprep.subr.bf16.mxu0 %v4138_v51  ;;  %v4210_v51 = vld [vmem:[#allocation6 + $0x9e4] ss:$8 sps:$4 sm:$0xff]  }
 0x1f4   :  { %2670 = vmatpush1.bf16.msra.mxu0 %v4136_v52  ;;  %v4208_v52 = vld [vmem:[#allocation6 + $0x9e0] ss:$8 sps:$4 sm:$0xff]  }
 0x1f5   :  { %2671 = vmatprep.subr.bf16.mxu0 %v4141_v53  ;;  %v4213_v53 = vld [vmem:[#allocation6 + $0x9f4] ss:$8 sps:$4 sm:$0xff]  }
 0x1f8   :  { %2672 = vmatpush1.bf16.msra.mxu0 %v4139_v54  ;;  %v4211_v54 = vld [vmem:[#allocation6 + $0x9f0] ss:$8 sps:$4 sm:$0xff]  }
 0x1f9   :  { %2673 = vmatprep.subr.bf16.mxu0 %v4144_v55 }
 0x1fc   :  { %2674 = vmatpush1.bf16.msra.mxu0 %v4142_v56  ;;  %v4226_v56 = vld [vmem:[#allocation9 + $0x70] sm:$0xff]  }
 0x1fd   :  { %2675 = vmatprep.subr.bf16.mxu0 %v4147_v57  ;;  %3611 = vmatprep.subr.bf16.mxu1 %v4226_v56 }
 0x200   :  { %2676 = vmatpush1.bf16.msra.mxu0 %v4145_v58  ;;  %v4227_v58 = vld [vmem:[#allocation9 + $0x30] sm:$0xff]  }
 0x201   :  { %2677 = vmatprep.subr.bf16.mxu0 %v4150_v59  ;;  %3612 = vmatpush3.bf16.msra.mxu1 %v4227_v58 }
 0x204   :  { %2678 = vmatpush1.bf16.msra.mxu0 %v4148_v60 }
 0x205   :  { %2679 = vmatprep.subr.bf16.mxu0 %v4153_v61  ;;  %v4228_v61 = vld [vmem:[#allocation9 + $0x78] sm:$0xff]  }
 0x206   :  { %3613 = vmatprep.subr.bf16.mxu1 %v4228_v61 }
 0x208   :  { %2680 = vmatpush1.bf16.msra.mxu0 %v4151_v62  ;;  %v4229_v62 = vld [vmem:[#allocation9 + $0x38] sm:$0xff]  }
 0x209   :  { %2681 = vmatprep.subr.bf16.mxu0 %v4156_v63  ;;  %3614 = vmatpush3.bf16.msra.mxu1 %v4229_v62  ;;  %v4478_v63 = vmov 0.0  }
 0x20a   :  { %3633 = vmatprep.subr.bf16.mxu1 %v4478_v63 }
 0x20c   :  { %2682 = vmatpush1.bf16.msra.mxu0 %v4154_v0  ;;  %v651_v0 = vsub.s32 0, %v650_v13 }
 0x20d   :  { %2683 = vmatprep.subr.bf16.mxu0 %v4159_v1  ;;  %v647_v1 = vld [vmem:[#allocation8] sm:$0x3] }
 0x210   :  { %2684 = vmatpush1.bf16.msra.mxu0 %v4157_v3  ;;  %v655_v3 = vsub.s32 1, %v650_v13 }
 0x211   :  { %2685 = vmatprep.subr.bf16.mxu0 %v4162_v4 }
 0x212   :  { %v656_v4 = vrot.slane %v647_v1, %v655_v3 }
 0x214   :  { %2686 = vmatpush1.bf16.msra.mxu0 %v4160_v5 }
 0x215   :  { %2687 = vmatprep.subr.bf16.mxu0 %v4165_v6 }
 0x218   :  { %2688 = vmatpush1.bf16.msra.mxu0 %v4163_v8 }
 0x219   :  { %2698 = vmatprep.subr.bf16.mxu0 %v4168_v9 }
 0x21b   :  { %3594 = vmatmul.mubr.msk.bf16.vlgmr.msra.gmra.mrb[0].mxu0 %vm3593_vm4, %v4476_v21 }
 0x21c   :  { %2699 = vmatpush1.bf16.msra.mxu0 %v4166_v10  ;;  %3596 = vmatprep.mubr.msk.bf16.mxu0 %vm3595_vm5, %v4476_v21 }
 0x21d   :  { %2700 = vmatprep.subr.bf16.mxu0 %v4171_v11 }
 0x220   :  { %2701 = vmatpush1.bf16.msra.mxu0 %v4169_v15 }
 0x221   :  { %2702 = vmatprep.subr.bf16.mxu0 %v4174_v16 }
 0x224   :  { %2703 = vmatpush1.bf16.msra.mxu0 %v4172_v17 }
 0x225   :  { %2704 = vmatprep.subr.bf16.mxu0 %v4177_v18 }
 0x228   :  { %2705 = vmatpush1.bf16.msra.mxu0 %v4175_v14 }
 0x229   :  { %2706 = vmatprep.subr.bf16.mxu0 %v4180_v19  ;;  %v4231_v19 = vld [vmem:[%s4770_s5 + $0x8] sm:$0xff]  }
 0x22c   :  { %2707 = vmatpush1.bf16.msra.mxu0 %v4178_v20  ;;  %v4232_v20 = vld [vmem:[%s4770_s5 + $0x10] sm:$0xff]  }
 0x22d   :  { %2708 = vmatprep.subr.bf16.mxu0 %v4183_v22  ;;  %v4233_v22 = vld [vmem:[%s4770_s5 + $0x18] sm:$0xff]  }
 0x230   :  { %2709 = vmatpush1.bf16.msra.mxu0 %v4181_v2  ;;  %v4234_v2 = vld [vmem:[%s4770_s5 + $0x20] sm:$0xff]  }
 0x231   :  { %2710 = vmatprep.subr.bf16.mxu0 %v4186_v25  ;;  %v4235_v25 = vld [vmem:[%s4770_s5 + $0x28] sm:$0xff]  }
 0x234   :  { %2711 = vmatpush1.bf16.msra.mxu0 %v4184_v27  ;;  %v4236_v27 = vld [vmem:[%s4770_s5 + $0x30] sm:$0xff]   ;;  %s4480_s5 = smov [#allocation17]  }
 0x235   :  { %2712 = vmatprep.subr.bf16.mxu0 %v4189_v32  ;;  %s3116_s22 = sshll.u32 %s4480_s5, 4  ;;  %s3117_s22 = int_to_ptr.vmem [resolvable:$true] %s3116_s22 }
 0x236   :  { %s4421_s29 = scalar_lea.vmem %s3117_s22, 128  ;;  %p4426_p9 = scmp.lt.s32.totalorder %s3117_s22, %s3117_s22 }
 0x237   :  { %p4422_p8 = scmp.ne.s32.totalorder %s3117_s22, %s4421_s29  ;;  %p4427_p10 = scmp.lt.s32.totalorder %s4421_s29, %s4421_s29 }
 0x238   :  { %2713 = vmatpush1.bf16.msra.mxu0 %v4187_v24 }
 0x239   :  { %2714 = vmatprep.subr.bf16.mxu0 %v4192_v35  ;;  %p4428_p11 = por %p4427_p10, %p4426_p9 }
 0x23b   :  { %p4429_p12 = pnand %p4428_p11, %p4422_p8 }
 0x23c   :  { %2715 = vmatpush1.bf16.msra.mxu0 %v4190_v38  ;;  %v4238_v38 = vld [vmem:[#allocation14] sm:$0xff]  }
 0x23d   :  { %2716 = vmatprep.subr.bf16.mxu0 %v4195_v40  ;;  %v4239_v40 = vld [vmem:[#allocation14 + $0x8] sm:$0xff]  }
 0x240   :  { %2717 = vmatpush1.bf16.msra.mxu0 %v4193_v23 }
 0x241   :  { %2718 = vmatprep.subr.bf16.mxu0 %v4198_v42 }
 0x244   :  { %2719 = vmatpush1.bf16.msra.mxu0 %v4196_v36 }
 0x245   :  { %2720 = vmatprep.subr.bf16.mxu0 %v4201_v44 }
 0x248   :  { %2721 = vmatpush1.bf16.msra.mxu0 %v4199_v46 }
 0x249   :  { %2722 = vmatprep.subr.bf16.mxu0 %v4204_v47 }
 0x24c   :  { %2723 = vmatpush1.bf16.msra.mxu0 %v4202_v48 }
 0x24d   :  { %2724 = vmatprep.subr.bf16.mxu0 %v4207_v49 }
 0x250   :  { %2725 = vmatpush1.bf16.msra.mxu0 %v4205_v50 }
 0x251   :  { %2726 = vmatprep.subr.bf16.mxu0 %v4210_v51 }
 0x254   :  { %2727 = vmatpush1.bf16.msra.mxu0 %v4208_v52 }
 0x255   :  { %2728 = vmatprep.subr.bf16.mxu0 %v4213_v53 }
 0x258   :  { %2729 = vmatpush1.bf16.msra.mxu0 %v4211_v54 }
 0x25b   :  { %3598 = vmatmul.mubr.msk.bf16.vlgmr.msra.gmra.mrb[0].mxu0 %vm3597_vm7, %v4476_v21  ;;  %v652_v21 = vrot.slane %v647_v1, %v651_v0 }
 0x2ad   :  { %v2486_v55 = vpop.f32.mrb[0].mxu1 }
 0x2ae   :  { %v2488_v57 = vpop.f32.mrb[1].mxu1  ;;  %v3661_v5 = vadd.f32 %v2486_v55, %v652_v21 }
 0x2af   :  { %v2490_v59 = vpop.f32.mrb[2].mxu1  ;;  %v3663_v6 = vadd.f32 %v2488_v57, %v656_v4 }
 0x2b0   :  { %v2491_v60 = vpop.f32.mrb[3].mxu1 }
 0x32e   :  { %v2732_v7 = vpop.f32.mrb[0].mxu0 }
 0x32f   :  { %v3662_v8 = vadd.f32 %v3661_v5, %v2732_v7  ;;  %v2734_v9 = vpop.f32.mrb[1].mxu0 }
 0x330   :  { %v3664_v10 = vadd.f32 %v3663_v6, %v2734_v9  ;;  %v2736_v11 = vpop.f32.mrb[2].mxu0 }
 0x331   :  { %v2739_v15 = vmax.f32 %v3662_v8, 0.0  ;;  %v2737_v16 = vpop.f32.mrb[3].mxu0 }
 0x332   :  { %v2740_v17 = vmax.f32 %v3664_v10, 0.0 }
 0x333   :  { %v2741_v14 = vpack.c.bf16 %v2739_v15, %v2739_v15 }
 0x334   :  { %v2742_v18 = vpack.c.bf16 %v2740_v17, %v2740_v17 }
 0x336   :  { %2910 = vmatprep.mubr.bf16.mxu1 %v2742_v18 }
 0x337   :  { %2911 = vmatmul.mubr.bf16.vlgmr.msra.gmra.mrb[4].mxu1 %v2741_v14 }
 0x338   :  { %3634 = vmatpush3.bf16.msra.mxu1 %v4230_v12  ;;  %3649 = vmatprep.mubr.msk.bf16.mxu1 %vm4479_vm8, %v4478_v63 }
 0x339   :  { %3635 = vmatprep.subr.bf16.mxu1 %v4478_v63 }
 0x33c   :  { %3636 = vmatpush3.bf16.msra.mxu1 %v4231_v19 }
 0x33d   :  { %3637 = vmatprep.subr.bf16.mxu1 %v4478_v63 }
 0x340   :  { %3638 = vmatpush3.bf16.msra.mxu1 %v4232_v20 }
 0x341   :  { %3639 = vmatprep.subr.bf16.mxu1 %v4478_v63 }
 0x344   :  { %3640 = vmatpush3.bf16.msra.mxu1 %v4233_v22 }
 0x345   :  { %3641 = vmatprep.subr.bf16.mxu1 %v4478_v63 }
 0x348   :  { %3642 = vmatpush3.bf16.msra.mxu1 %v4234_v2 }
 0x349   :  { %3643 = vmatprep.subr.bf16.mxu1 %v4478_v63 }
 0x34c   :  { %3644 = vmatpush3.bf16.msra.mxu1 %v4235_v25 }
 0x34d   :  { %3645 = vmatprep.subr.bf16.mxu1 %v4478_v63 }
 0x350   :  { %3646 = vmatpush3.bf16.msra.mxu1 %v4236_v27 }
 0x351   :  { %3647 = vmatprep.subr.bf16.mxu1 %v4478_v63 }
 0x354   :  { %3648 = vmatpush3.bf16.msra.mxu1 %v4237_v28 }
 0x355   :  { %3653 = vmatprep.subr.bf16.mxu1 %v4478_v63 }
 0x40a   :  { %v3615_v31 = vpop.f32.mrb[4].mxu1 }
 0x40b   :  { %v3616_v32 = vpop.f32.mrb[5].mxu1 }
 0x40c   :  { %v3617_v33 = vadd.f32 %v3616_v32, %v3615_v31  ;;  %v3618_v24 = vpop.f32.mrb[6].mxu1 }
 0x40d   :  { %v3619_v34 = vpop.f32.mrb[7].mxu1 }
 0x40e   :  { %v2913_v35 = vadd.f32 %v3617_v33, %v3499_v29 }
 0x410   :  { %v2918_v37 = vmax.f32 %v2913_v35, 0.0 }
 0x412   :  { %v2919_v39 = vpack.c.bf16 %v2918_v37, %v2918_v37 }
 0x414   :  { %3650 = vmatmul.mubr.bf16.vlgmr.msra.gmra.mrb[8].mxu1 %v2919_v39 }
 0x415   :  { %3654 = vmatpush3.bf16.msra.mxu1 %v4238_v38  ;;  %3657 = vmatprep.mubr.msk.bf16.mxu1 %vm4479_vm8, %v4478_v63 }
 0x416   :  { %3655 = vmatprep.subr.bf16.mxu1 %v4478_v63 }
 0x419   :  { %3656 = vmatpush3.bf16.msra.mxu1 %v4239_v40 }
 0x4e7   :  { %v3025_v23 = vpop.f32.mrb[8].mxu1 }
 0x4e8   :  { %v3026_v41 = vadd.f32 %v3516_v26, %v3025_v23  ;;  %v3651_v42 = vpop.f32.mrb[9].mxu1 }
 0x4e9   :  { %v3028_v43 = vpop.f32.mrb[10].mxu1 }
 0x4ea   :  { %v3031_v36 = vmax.f32 %v3026_v41, 0.0  ;;  %v3652_v30 = vpop.f32.mrb[11].mxu1 }
 0x4ec   :  { %v3032_v44 = vpack.c.bf16 %v3031_v36, %v3031_v36 }
 0x4ee   :  { %3658 = vmatmul.mubr.msk.bf16.vlgmr.msra.gmra.mrb[12].mxu1 %vm3056_vm9, %v3032_v44 }
 0x5c1   :  { %v3094_v46 = vpop.f32.mrb[12].mxu1 }
 0x5c2   :  { %v3095_v47 = vadd.f32 %v3525_v45, %v3094_v46  ;;  %v3659_v48 = vpop.f32.mrb[13].mxu1 }
 0x5c3   :  { %v3097_v49 = vpop.f32.mrb[14].mxu1 }
 0x5c4   :  { %3100 = vmax.xlane.f32.xlu1 %v3095_v47  ;;  %v3660_v50 = vpop.f32.mrb[15].mxu1 }
 0x651   :  { %v3101_v51 = vpop.xlane.xlu1 %3100 }
 0x652   :  { %v3102_v52 = vsub.f32 %v3095_v47, %v3101_v51 }
 0x654   :  { %v3103_v53 = vmul.f32 1.442695, %v3102_v52 }
 0x656   :  { %4240 = vpow2.f32 %v3103_v53 }
 0x660   :  { %v4241_v54 = vpop.eup %4240 }
 0x661   :  { %3105 = vadd.xlane.f32.xlu0 %v4241_v54 }
 0x6ee   :  { %v3106_v55 = vpop.xlane.xlu0 %3105 }
 0x6ef   :  { %4242 = vrcp.f32 %v3106_v55 }
 0x6f9   :  { %v4243_v56 = vpop.eup %4242 }
 0x6fa   :  { %v3108_v57 = vmul.f32 %v4243_v56, %v4241_v54 }
 0x6fc   :  { %3109 = vst [vmem:[#allocation17] sm:$0xff] %v3108_v57 }
 0x6fd   :  { %4432 = shalt.err (!%p4429_p12)
}
 0x6fe   :  { %s4433_s12 = scalar_lea.hbm %s4774_s9, 128 }
 0x6ff   :  { %p4434_p13 = scmp.ne.s32.totalorder %s4774_s9, %s4433_s12  ;;  %p4437_p0 = scmp.lt.u32.totalorder %s4433_s12, %s4774_s9 }
 0x701   :  { %p4439_p1 = pnand %p4437_p0, %p4434_p13 }
 0x703   :  { %4442 = shalt.err (!%p4439_p1)
}
 0x704   :  { %3119 = dma.vmem_to_hbm [thread:$0]  %s3117_s22, 128, %s4774_s9, [#allocation5]  }
 0x705   :  { %4453 = dma.done.wait [#allocation5], 128  }
 0x706   :  { %4454 = vsyncadd [#allocation5], 4294967168 }
 0x707   :  { %3123 = vsyncpa [#allocation4], 1 }
 0x708   :  { %3124 = vsyncpa [#allocation7], 1 }
 0x709   :  { %3125 = vsyncpa [#allocation10], 1 }
 0x70a   :  { %3126 = vsyncpa [#allocation13], 1 }
 0x70b   :  { %3127 = vsyncpa [#allocation16], 1 }
 0x70c   :  { %3128 = vsyncpa [#allocation5], 1 }

</bundles_post_ra>
